<compile_context>
chip_gen: v7x
topology: tpu7x:2x2x1
jax: 0.10.0
libtpu: 0.0.40
codegen_flags: <defaults>
</compile_context>

<pallas_src>
import functools

import jax
import jax.numpy as jnp
from jax import lax
from jax.experimental import pallas as pl
from jax.experimental.pallas import tpu as pltpu
import numpy as np


def lstmcnn_kernel(emb_ref,                    # (S*B, E)   time-major, flattened
                   w_in_ref, b_in_ref,         # (E, 9H), (1, 9H)
                   whh_f_ref, whh_b_ref,       # (H, 4H) each
                   wlin_h_ref,                 # (2H, H)   [fwd rows | bwd rows]
                   wext_ref, b_ext_ref,        # (H, 256), (1, 256)
                   wcls_ref, b_cls_ref,        # (256, 128), (1, 128)  lane-padded
                   fea_ref, out_ref,           # (B, 256), (B, 128)
                   xp_ref, hid_ref,            # VMEM: (S*B, 9H), (S*B, 2H)
                   *, S):
    SB, E = emb_ref.shape
    B = SB // S
    H = whh_f_ref.shape[0]
    H4, H8 = 4 * H, 8 * H

    # One big input projection for both LSTM directions + the emb part of the
    # post-LSTM linear; all biases folded in.  Columns:
    #   [0:4H)   x@Wih_f + b_f
    #   [4H:8H)  x@Wih_b + b_b
    #   [8H:9H)  x@Wlin_e + b_lin
    xp_ref[...] = (jnp.dot(emb_ref[...], w_in_ref[...],
                           preferred_element_type=jnp.float32)
                   + b_in_ref[...])

    whh_f = whh_f_ref[...]
    whh_b = whh_b_ref[...]

    def gates_to_hc(gates, c):
        # PyTorch gate order: i, f, g, o.  Run sigmoid/tanh once over the full
        # (B, 4H) block, then take lane slices.
        sg = jax.nn.sigmoid(gates)
        th = jnp.tanh(gates)
        i = sg[:, 0:H]
        f = sg[:, H:2 * H]
        g = th[:, 2 * H:3 * H]
        o = sg[:, 3 * H:4 * H]
        c_new = f * c + i * g
        h_new = o * jnp.tanh(c_new)
        return h_new, c_new

    h_f = jnp.zeros((B, H), jnp.float32)
    c_f = jnp.zeros((B, H), jnp.float32)
    h_b = jnp.zeros((B, H), jnp.float32)
    c_b = jnp.zeros((B, H), jnp.float32)

    # Fused, fully unrolled bidirectional recurrence (S static & small).
    for t in range(S):
        tb = S - 1 - t
        g_f = (xp_ref[t * B:(t + 1) * B, 0:H4]
               + jnp.dot(h_f, whh_f, preferred_element_type=jnp.float32))
        g_b = (xp_ref[tb * B:(tb + 1) * B, H4:H8]
               + jnp.dot(h_b, whh_b, preferred_element_type=jnp.float32))
        h_f, c_f = gates_to_hc(g_f, c_f)
        h_b, c_b = gates_to_hc(g_b, c_b)
        hid_ref[t * B:(t + 1) * B, 0:H] = h_f
        hid_ref[tb * B:(tb + 1) * B, H:2 * H] = h_b

    # linear over concat([h_fwd, emb, h_bwd]) as one stacked matmul; the emb
    # contribution (+ b_lin) was precomputed into xp columns [8H:9H).
    lin = (jnp.dot(hid_ref[...], wlin_h_ref[...],
                   preferred_element_type=jnp.float32)
           + xp_ref[:, H8:H8 + H])
    act = jnp.tanh(lin)                       # (S*B, H)

    # F.max_pool1d over the full sequence == max over the seq axis.
    pooled = act[0:B, :]
    for t in range(1, S):
        pooled = jnp.maximum(pooled, act[t * B:(t + 1) * B, :])

    fea = (jnp.dot(pooled, wext_ref[...], preferred_element_type=jnp.float32)
           + b_ext_ref[...])
    # nn.Dropout is identity at inference time
    logits = (jnp.dot(fea, wcls_ref[...], preferred_element_type=jnp.float32)
              + b_cls_ref[...])

    fea_ref[...] = fea
    out_ref[...] = logits


def lstmcnn_forward(x_tokens, p):
    # glue: embedding gather + permute(1, 0, 2)  (time-major, like nn.LSTM)
    emb = p['embedding'][x_tokens]            # (B, S, E)
    emb = jnp.transpose(emb, (1, 0, 2))       # (S, B, E)
    S, B, E = emb.shape
    H = p['whh_f'].shape[0]

    # sublane-pad batch to a multiple of 8 so per-step tiles are dense
    B_pad = -(-B // 8) * 8
    if B_pad != B:
        emb = jnp.pad(emb, ((0, 0), (0, B_pad - B), (0, 0)))
    emb2d = emb.reshape(S * B_pad, E)

    # fuse both LSTM input projections and the emb-part of the post-LSTM
    # linear into one (E, 9H) weight; fold their biases in as well.
    w_in = jnp.concatenate([p['wih_f'], p['wih_b'], p['wlin_e']], axis=1)   # (E, 9H)
    b_in = jnp.concatenate([p['b_f'], p['b_b'], p['b_lin']], axis=1)        # (1, 9H)
    wlin_h = jnp.concatenate([p['wlin_hf'], p['wlin_hb']], axis=0)          # (2H, H)

    # lane-pad the 2-wide classifier to 128 so the final store is dense
    CLS = p['wcls'].shape[1]
    CLS_PAD = 128
    wcls = jnp.pad(p['wcls'], ((0, 0), (0, CLS_PAD - CLS)))
    b_cls = jnp.pad(p['b_cls'], ((0, 0), (0, CLS_PAD - CLS)))

    vmem = lambda: pl.BlockSpec(memory_space=pltpu.MemorySpace.VMEM)
    args = (emb2d, w_in, b_in, p['whh_f'], p['whh_b'], wlin_h,
            p['wext'], p['b_ext'], wcls, b_cls)

    fea, out = pl.pallas_call(
        functools.partial(lstmcnn_kernel, S=S),
        out_shape=(jax.ShapeDtypeStruct((B_pad, p['wext'].shape[1]), jnp.float32),
                   jax.ShapeDtypeStruct((B_pad, CLS_PAD), jnp.float32)),
        in_specs=[vmem() for _ in args],
        out_specs=(vmem(), vmem()),
        scratch_shapes=[pltpu.VMEM((S * B_pad, 9 * H), jnp.float32),
                        pltpu.VMEM((S * B_pad, 2 * H), jnp.float32)],
        # TODO(synk): at production sizes add a batch grid ("parallel") and an
        # explicit vmem_limit_bytes so v7x's 64 MiB VMEM / 2 TCs are used;
        # unnecessary at these toy shapes.
    )(*args)
    return fea[:B], out[:B, :CLS]


def reference_forward(x_tokens, p):
    # pure-JAX reference with identical parameter layout
    emb = p['embedding'][x_tokens]
    embp = jnp.transpose(emb, (1, 0, 2))      # (S, B, E)
    S, B, E = embp.shape
    H = p['whh_f'].shape[0]

    def run(wih, whh, b, xs):
        def step(carry, x_t):
            h, c = carry
            gates = x_t @ wih + h @ whh + b
            i = jax.nn.sigmoid(gates[:, :H])
            f = jax.nn.sigmoid(gates[:, H:2 * H])
            g = jnp.tanh(gates[:, 2 * H:3 * H])
            o = jax.nn.sigmoid(gates[:, 3 * H:])
            c = f * c + i * g
            h = o * jnp.tanh(c)
            return (h, c), h
        h0 = jnp.zeros((B, H), jnp.float32)
        c0 = jnp.zeros((B, H), jnp.float32)
        _, hs = lax.scan(step, (h0, c0), xs)
        return hs

    fwd = run(p['wih_f'], p['whh_f'], p['b_f'], embp)
    bwd = run(p['wih_b'], p['whh_b'], p['b_b'], embp[::-1])[::-1]
    lin = (jnp.einsum('sbh,hk->sbk', fwd, p['wlin_hf'])
           + jnp.einsum('sbe,ek->sbk', embp, p['wlin_e'])
           + jnp.einsum('sbh,hk->sbk', bwd, p['wlin_hb'])
           + p['b_lin'])
    act = jnp.tanh(lin)
    pooled = jnp.max(act, axis=0)
    fea = pooled @ p['wext'] + p['b_ext']
    out = fea @ p['wcls'] + p['b_cls']
    return fea, out


def init_params(key, vocab=20, E=16, H=32):
    ks = jax.random.split(key, 16)
    u = lambda k, shape, s=0.1: (jax.random.uniform(k, shape, jnp.float32) - 0.5) * 2 * s
    p = {
        'embedding': u(ks[0], (vocab, E), 0.5),
        # biLSTM weights, pre-transposed: (in, 4H), (H, 4H); biases fused (b_ih+b_hh)
        'wih_f': u(ks[1], (E, 4 * H)), 'whh_f': u(ks[2], (H, 4 * H)), 'b_f': u(ks[3], (1, 4 * H)),
        'wih_b': u(ks[4], (E, 4 * H)), 'whh_b': u(ks[5], (H, 4 * H)), 'b_b': u(ks[6], (1, 4 * H)),
        # linear over concat([h_fwd, emb, h_bwd]) split into three (in, H) blocks
        'wlin_hf': u(ks[7], (H, H)), 'wlin_e': u(ks[8], (E, H)), 'wlin_hb': u(ks[9], (H, H)),
        'b_lin': u(ks[10], (1, H)),
        'wext': u(ks[11], (H, 256)), 'b_ext': u(ks[12], (1, 256)),
        'wcls': u(ks[13], (256, 2)), 'b_cls': u(ks[14], (1, 2)),
    }
    return p


if __name__ == "__main__":
    key = jax.random.PRNGKey(0)
    kp, kx = jax.random.split(key)

    VOCAB, E, H = 20, 16, 32
    B, S = 2, 8

    params = init_params(kp, vocab=VOCAB, E=E, H=H)
    x_tokens = jax.random.randint(kx, (B, S), 0, VOCAB, dtype=jnp.int32)

    fea, out = jax.jit(lstmcnn_forward)(x_tokens, params)
    jax.block_until_ready((fea, out))

    fea_ref, out_ref = reference_forward(x_tokens, params)
    np.testing.assert_allclose(np.asarray(fea), np.asarray(fea_ref), rtol=1e-4, atol=1e-4)
    np.testing.assert_allclose(np.asarray(out), np.asarray(out_ref), rtol=1e-4, atol=1e-4)

    print("KERNEL_OK")
</pallas_src>

<mosaic_0001>
module attributes {stable_mosaic.version = 11 : i64} {
  func.func @lstmcnn_kernel(%arg0: memref<64x16xf32, #tpu.memory_space<vmem>>, %arg1: memref<16x288xf32, #tpu.memory_space<vmem>>, %arg2: memref<1x288xf32, #tpu.memory_space<vmem>>, %arg3: memref<32x128xf32, #tpu.memory_space<vmem>>, %arg4: memref<32x128xf32, #tpu.memory_space<vmem>>, %arg5: memref<64x32xf32, #tpu.memory_space<vmem>>, %arg6: memref<32x256xf32, #tpu.memory_space<vmem>>, %arg7: memref<1x256xf32, #tpu.memory_space<vmem>>, %arg8: memref<256x128xf32, #tpu.memory_space<vmem>>, %arg9: memref<1x128xf32, #tpu.memory_space<vmem>>, %arg10: memref<8x256xf32, #tpu.memory_space<vmem>>, %arg11: memref<8x128xf32, #tpu.memory_space<vmem>>, %arg12: memref<64x288xf32, #tpu.memory_space<vmem>>, %arg13: memref<64x64xf32, #tpu.memory_space<vmem>>) attributes {dimension_semantics = [], scalar_prefetch = 0 : i64, scratch_operands = 2 : i64, tpu.core_type = #tpu.core_type<tc>} {
    %c0 = arith.constant 0 : index
    %c0_0 = arith.constant 0 : index
    %0 = vector.load %arg0[%c0, %c0_0] : memref<64x16xf32, #tpu.memory_space<vmem>>, vector<64x16xf32>
    %c0_1 = arith.constant 0 : index
    %c0_2 = arith.constant 0 : index
    %1 = vector.load %arg1[%c0_1, %c0_2] : memref<16x288xf32, #tpu.memory_space<vmem>>, vector<16x288xf32>
    %cst = arith.constant dense<0.000000e+00> : vector<64x288xf32>
    %2 = tpu.matmul %0, %1, %cst {dimension_numbers = #tpu.dot_dimension_numbers<[1], [0], [0], [1], [0, 0, 1, 1], [], []>} : vector<64x16xf32>, vector<16x288xf32>, vector<64x288xf32> -> vector<64x288xf32>
    %c0_3 = arith.constant 0 : index
    %c0_4 = arith.constant 0 : index
    %3 = vector.load %arg2[%c0_3, %c0_4] : memref<1x288xf32, #tpu.memory_space<vmem>>, vector<1x288xf32>
    %4 = vector.broadcast %3 : vector<1x288xf32> to vector<64x288xf32>
    %5 = arith.addf %2, %4 : vector<64x288xf32>
    %c0_5 = arith.constant 0 : index
    %c0_6 = arith.constant 0 : index
    %6 = vector.load %arg12[%c0_5, %c0_6] : memref<64x288xf32, #tpu.memory_space<vmem>>, vector<64x288xf32>
    tpu.vector_store %arg12[%c0_5, %c0_6], %5 {strides = array<i32>} : memref<64x288xf32, #tpu.memory_space<vmem>>, vector<64x288xf32>,
    %c0_7 = arith.constant 0 : index
    %c0_8 = arith.constant 0 : index
    %7 = vector.load %arg3[%c0_7, %c0_8] : memref<32x128xf32, #tpu.memory_space<vmem>>, vector<32x128xf32>
    %c0_9 = arith.constant 0 : index
    %c0_10 = arith.constant 0 : index
    %8 = vector.load %arg4[%c0_9, %c0_10] : memref<32x128xf32, #tpu.memory_space<vmem>>, vector<32x128xf32>
    %cst_11 = arith.constant 0.000000e+00 : f32
    %9 = vector.broadcast %cst_11 : f32 to vector<8x32xf32>
    %cst_12 = arith.constant 0.000000e+00 : f32
    %10 = vector.broadcast %cst_12 : f32 to vector<8x32xf32>
    %cst_13 = arith.constant 0.000000e+00 : f32
    %11 = vector.broadcast %cst_13 : f32 to vector<8x32xf32>
    %cst_14 = arith.constant 0.000000e+00 : f32
    %12 = vector.broadcast %cst_14 : f32 to vector<8x32xf32>
    %c0_15 = arith.constant 0 : index
    %c0_16 = arith.constant 0 : index
    %13 = vector.load %arg12[%c0_15, %c0_16] : memref<64x288xf32, #tpu.memory_space<vmem>>, vector<8x128xf32>
    %cst_17 = arith.constant dense<0.000000e+00> : vector<8x128xf32>
    %14 = tpu.matmul %9, %7, %cst_17 {dimension_numbers = #tpu.dot_dimension_numbers<[1], [0], [0], [1], [0, 0, 1, 1], [], []>} : vector<8x32xf32>, vector<32x128xf32>, vector<8x128xf32> -> vector<8x128xf32>
    %15 = arith.addf %13, %14 : vector<8x128xf32>
    %c56 = arith.constant 56 : index
    %c128 = arith.constant 128 : index
    %16 = vector.load %arg12[%c56, %c128] : memref<64x288xf32, #tpu.memory_space<vmem>>, vector<8x128xf32>
    %cst_18 = arith.constant dense<0.000000e+00> : vector<8x128xf32>
    %17 = tpu.matmul %11, %8, %cst_18 {dimension_numbers = #tpu.dot_dimension_numbers<[1], [0], [0], [1], [0, 0, 1, 1], [], []>} : vector<8x32xf32>, vector<32x128xf32>, vector<8x128xf32> -> vector<8x128xf32>
    %18 = arith.addf %16, %17 : vector<8x128xf32>
    %19 = arith.negf %15 : vector<8x128xf32>
    %20 = math.exp %19 : vector<8x128xf32>
    %cst_19 = arith.constant 1.000000e+00 : f32
    %21 = vector.broadcast %cst_19 : f32 to vector<8x128xf32>
    %22 = arith.addf %21, %20 : vector<8x128xf32>
    %23 = arith.divf %21, %22 : vector<8x128xf32>
    %24 = math.tanh %15 : vector<8x128xf32>
    %25 = vector.extract_strided_slice %23 {offsets = [0, 0], sizes = [8, 32], strides = [1, 1]} : vector<8x128xf32> to vector<8x32xf32>
    %26 = vector.extract_strided_slice %23 {offsets = [0, 32], sizes = [8, 32], strides = [1, 1]} : vector<8x128xf32> to vector<8x32xf32>
    %27 = vector.extract_strided_slice %24 {offsets = [0, 64], sizes = [8, 32], strides = [1, 1]} : vector<8x128xf32> to vector<8x32xf32>
    %28 = vector.extract_strided_slice %23 {offsets = [0, 96], sizes = [8, 32], strides = [1, 1]} : vector<8x128xf32> to vector<8x32xf32>
    %29 = arith.mulf %26, %10 : vector<8x32xf32>
    %30 = arith.mulf %25, %27 : vector<8x32xf32>
    %31 = arith.addf %29, %30 : vector<8x32xf32>
    %32 = math.tanh %31 : vector<8x32xf32>
    %33 = arith.mulf %28, %32 : vector<8x32xf32>
    %34 = arith.negf %18 : vector<8x128xf32>
    %35 = math.exp %34 : vector<8x128xf32>
    %cst_20 = arith.constant 1.000000e+00 : f32
    %36 = vector.broadcast %cst_20 : f32 to vector<8x128xf32>
    %37 = arith.addf %36, %35 : vector<8x128xf32>
    %38 = arith.divf %36, %37 : vector<8x128xf32>
    %39 = math.tanh %18 : vector<8x128xf32>
    %40 = vector.extract_strided_slice %38 {offsets = [0, 0], sizes = [8, 32], strides = [1, 1]} : vector<8x128xf32> to vector<8x32xf32>
    %41 = vector.extract_strided_slice %38 {offsets = [0, 32], sizes = [8, 32], strides = [1, 1]} : vector<8x128xf32> to vector<8x32xf32>
    %42 = vector.extract_strided_slice %39 {offsets = [0, 64], sizes = [8, 32], strides = [1, 1]} : vector<8x128xf32> to vector<8x32xf32>
    %43 = vector.extract_strided_slice %38 {offsets = [0, 96], sizes = [8, 32], strides = [1, 1]} : vector<8x128xf32> to vector<8x32xf32>
    %44 = arith.mulf %41, %12 : vector<8x32xf32>
    %45 = arith.mulf %40, %42 : vector<8x32xf32>
    %46 = arith.addf %44, %45 : vector<8x32xf32>
    %47 = math.tanh %46 : vector<8x32xf32>
    %48 = arith.mulf %43, %47 : vector<8x32xf32>
    %c0_21 = arith.constant 0 : index
    %c0_22 = arith.constant 0 : index
    %49 = vector.load %arg13[%c0_21, %c0_22] : memref<64x64xf32, #tpu.memory_space<vmem>>, vector<8x32xf32>
    tpu.vector_store %arg13[%c0_21, %c0_22], %33 {strides = array<i32>} : memref<64x64xf32, #tpu.memory_space<vmem>>, vector<8x32xf32>,
    %c56_23 = arith.constant 56 : index
    %c32 = arith.constant 32 : index
    %50 = vector.load %arg13[%c56_23, %c32] : memref<64x64xf32, #tpu.memory_space<vmem>>, vector<8x32xf32>
    tpu.vector_store %arg13[%c56_23, %c32], %48 {strides = array<i32>} : memref<64x64xf32, #tpu.memory_space<vmem>>, vector<8x32xf32>,
    %c8 = arith.constant 8 : index
    %c0_24 = arith.constant 0 : index
    %51 = vector.load %arg12[%c8, %c0_24] : memref<64x288xf32, #tpu.memory_space<vmem>>, vector<8x128xf32>
    %cst_25 = arith.constant dense<0.000000e+00> : vector<8x128xf32>
    %52 = tpu.matmul %33, %7, %cst_25 {dimension_numbers = #tpu.dot_dimension_numbers<[1], [0], [0], [1], [0, 0, 1, 1], [], []>} : vector<8x32xf32>, vector<32x128xf32>, vector<8x128xf32> -> vector<8x128xf32>
    %53 = arith.addf %51, %52 : vector<8x128xf32>
    %c48 = arith.constant 48 : index
    %c128_26 = arith.constant 128 : index
    %54 = vector.load %arg12[%c48, %c128_26] : memref<64x288xf32, #tpu.memory_space<vmem>>, vector<8x128xf32>
    %cst_27 = arith.constant dense<0.000000e+00> : vector<8x128xf32>
    %55 = tpu.matmul %48, %8, %cst_27 {dimension_numbers = #tpu.dot_dimension_numbers<[1], [0], [0], [1], [0, 0, 1, 1], [], []>} : vector<8x32xf32>, vector<32x128xf32>, vector<8x128xf32> -> vector<8x128xf32>
    %56 = arith.addf %54, %55 : vector<8x128xf32>
    %57 = arith.negf %53 : vector<8x128xf32>
    %58 = math.exp %57 : vector<8x128xf32>
    %cst_28 = arith.constant 1.000000e+00 : f32
    %59 = vector.broadcast %cst_28 : f32 to vector<8x128xf32>
    %60 = arith.addf %59, %58 : vector<8x128xf32>
    %61 = arith.divf %59, %60 : vector<8x128xf32>
    %62 = math.tanh %53 : vector<8x128xf32>
    %63 = vector.extract_strided_slice %61 {offsets = [0, 0], sizes = [8, 32], strides = [1, 1]} : vector<8x128xf32> to vector<8x32xf32>
    %64 = vector.extract_strided_slice %61 {offsets = [0, 32], sizes = [8, 32], strides = [1, 1]} : vector<8x128xf32> to vector<8x32xf32>
    %65 = vector.extract_strided_slice %62 {offsets = [0, 64], sizes = [8, 32], strides = [1, 1]} : vector<8x128xf32> to vector<8x32xf32>
    %66 = vector.extract_strided_slice %61 {offsets = [0, 96], sizes = [8, 32], strides = [1, 1]} : vector<8x128xf32> to vector<8x32xf32>
    %67 = arith.mulf %64, %31 : vector<8x32xf32>
    %68 = arith.mulf %63, %65 : vector<8x32xf32>
    %69 = arith.addf %67, %68 : vector<8x32xf32>
    %70 = math.tanh %69 : vector<8x32xf32>
    %71 = arith.mulf %66, %70 : vector<8x32xf32>
    %72 = arith.negf %56 : vector<8x128xf32>
    %73 = math.exp %72 : vector<8x128xf32>
    %cst_29 = arith.constant 1.000000e+00 : f32
    %74 = vector.broadcast %cst_29 : f32 to vector<8x128xf32>
    %75 = arith.addf %74, %73 : vector<8x128xf32>
    %76 = arith.divf %74, %75 : vector<8x128xf32>
    %77 = math.tanh %56 : vector<8x128xf32>
    %78 = vector.extract_strided_slice %76 {offsets = [0, 0], sizes = [8, 32], strides = [1, 1]} : vector<8x128xf32> to vector<8x32xf32>
    %79 = vector.extract_strided_slice %76 {offsets = [0, 32], sizes = [8, 32], strides = [1, 1]} : vector<8x128xf32> to vector<8x32xf32>
    %80 = vector.extract_strided_slice %77 {offsets = [0, 64], sizes = [8, 32], strides = [1, 1]} : vector<8x128xf32> to vector<8x32xf32>
    %81 = vector.extract_strided_slice %76 {offsets = [0, 96], sizes = [8, 32], strides = [1, 1]} : vector<8x128xf32> to vector<8x32xf32>
    %82 = arith.mulf %79, %46 : vector<8x32xf32>
    %83 = arith.mulf %78, %80 : vector<8x32xf32>
    %84 = arith.addf %82, %83 : vector<8x32xf32>
    %85 = math.tanh %84 : vector<8x32xf32>
    %86 = arith.mulf %81, %85 : vector<8x32xf32>
    %c8_30 = arith.constant 8 : index
    %c0_31 = arith.constant 0 : index
    %87 = vector.load %arg13[%c8_30, %c0_31] : memref<64x64xf32, #tpu.memory_space<vmem>>, vector<8x32xf32>
    tpu.vector_store %arg13[%c8_30, %c0_31], %71 {strides = array<i32>} : memref<64x64xf32, #tpu.memory_space<vmem>>, vector<8x32xf32>,
    %c48_32 = arith.constant 48 : index
    %c32_33 = arith.constant 32 : index
    %88 = vector.load %arg13[%c48_32, %c32_33] : memref<64x64xf32, #tpu.memory_space<vmem>>, vector<8x32xf32>
    tpu.vector_store %arg13[%c48_32, %c32_33], %86 {strides = array<i32>} : memref<64x64xf32, #tpu.memory_space<vmem>>, vector<8x32xf32>,
    %c16 = arith.constant 16 : index
    %c0_34 = arith.constant 0 : index
    %89 = vector.load %arg12[%c16, %c0_34] : memref<64x288xf32, #tpu.memory_space<vmem>>, vector<8x128xf32>
    %cst_35 = arith.constant dense<0.000000e+00> : vector<8x128xf32>
    %90 = tpu.matmul %71, %7, %cst_35 {dimension_numbers = #tpu.dot_dimension_numbers<[1], [0], [0], [1], [0, 0, 1, 1], [], []>} : vector<8x32xf32>, vector<32x128xf32>, vector<8x128xf32> -> vector<8x128xf32>
    %91 = arith.addf %89, %90 : vector<8x128xf32>
    %c40 = arith.constant 40 : index
    %c128_36 = arith.constant 128 : index
    %92 = vector.load %arg12[%c40, %c128_36] : memref<64x288xf32, #tpu.memory_space<vmem>>, vector<8x128xf32>
    %cst_37 = arith.constant dense<0.000000e+00> : vector<8x128xf32>
    %93 = tpu.matmul %86, %8, %cst_37 {dimension_numbers = #tpu.dot_dimension_numbers<[1], [0], [0], [1], [0, 0, 1, 1], [], []>} : vector<8x32xf32>, vector<32x128xf32>, vector<8x128xf32> -> vector<8x128xf32>
    %94 = arith.addf %92, %93 : vector<8x128xf32>
    %95 = arith.negf %91 : vector<8x128xf32>
    %96 = math.exp %95 : vector<8x128xf32>
    %cst_38 = arith.constant 1.000000e+00 : f32
    %97 = vector.broadcast %cst_38 : f32 to vector<8x128xf32>
    %98 = arith.addf %97, %96 : vector<8x128xf32>
    %99 = arith.divf %97, %98 : vector<8x128xf32>
    %100 = math.tanh %91 : vector<8x128xf32>
    %101 = vector.extract_strided_slice %99 {offsets = [0, 0], sizes = [8, 32], strides = [1, 1]} : vector<8x128xf32> to vector<8x32xf32>
    %102 = vector.extract_strided_slice %99 {offsets = [0, 32], sizes = [8, 32], strides = [1, 1]} : vector<8x128xf32> to vector<8x32xf32>
    %103 = vector.extract_strided_slice %100 {offsets = [0, 64], sizes = [8, 32], strides = [1, 1]} : vector<8x128xf32> to vector<8x32xf32>
    %104 = vector.extract_strided_slice %99 {offsets = [0, 96], sizes = [8, 32], strides = [1, 1]} : vector<8x128xf32> to vector<8x32xf32>
    %105 = arith.mulf %102, %69 : vector<8x32xf32>
    %106 = arith.mulf %101, %103 : vector<8x32xf32>
    %107 = arith.addf %105, %106 : vector<8x32xf32>
    %108 = math.tanh %107 : vector<8x32xf32>
    %109 = arith.mulf %104, %108 : vector<8x32xf32>
    %110 = arith.negf %94 : vector<8x128xf32>
    %111 = math.exp %110 : vector<8x128xf32>
    %cst_39 = arith.constant 1.000000e+00 : f32
    %112 = vector.broadcast %cst_39 : f32 to vector<8x128xf32>
    %113 = arith.addf %112, %111 : vector<8x128xf32>
    %114 = arith.divf %112, %113 : vector<8x128xf32>
    %115 = math.tanh %94 : vector<8x128xf32>
    %116 = vector.extract_strided_slice %114 {offsets = [0, 0], sizes = [8, 32], strides = [1, 1]} : vector<8x128xf32> to vector<8x32xf32>
    %117 = vector.extract_strided_slice %114 {offsets = [0, 32], sizes = [8, 32], strides = [1, 1]} : vector<8x128xf32> to vector<8x32xf32>
    %118 = vector.extract_strided_slice %115 {offsets = [0, 64], sizes = [8, 32], strides = [1, 1]} : vector<8x128xf32> to vector<8x32xf32>
    %119 = vector.extract_strided_slice %114 {offsets = [0, 96], sizes = [8, 32], strides = [1, 1]} : vector<8x128xf32> to vector<8x32xf32>
    %120 = arith.mulf %117, %84 : vector<8x32xf32>
    %121 = arith.mulf %116, %118 : vector<8x32xf32>
    %122 = arith.addf %120, %121 : vector<8x32xf32>
    %123 = math.tanh %122 : vector<8x32xf32>
    %124 = arith.mulf %119, %123 : vector<8x32xf32>
    %c16_40 = arith.constant 16 : index
    %c0_41 = arith.constant 0 : index
    %125 = vector.load %arg13[%c16_40, %c0_41] : memref<64x64xf32, #tpu.memory_space<vmem>>, vector<8x32xf32>
    tpu.vector_store %arg13[%c16_40, %c0_41], %109 {strides = array<i32>} : memref<64x64xf32, #tpu.memory_space<vmem>>, vector<8x32xf32>,
    %c40_42 = arith.constant 40 : index
    %c32_43 = arith.constant 32 : index
    %126 = vector.load %arg13[%c40_42, %c32_43] : memref<64x64xf32, #tpu.memory_space<vmem>>, vector<8x32xf32>
    tpu.vector_store %arg13[%c40_42, %c32_43], %124 {strides = array<i32>} : memref<64x64xf32, #tpu.memory_space<vmem>>, vector<8x32xf32>,
    %c24 = arith.constant 24 : index
    %c0_44 = arith.constant 0 : index
    %127 = vector.load %arg12[%c24, %c0_44] : memref<64x288xf32, #tpu.memory_space<vmem>>, vector<8x128xf32>
    %cst_45 = arith.constant dense<0.000000e+00> : vector<8x128xf32>
    %128 = tpu.matmul %109, %7, %cst_45 {dimension_numbers = #tpu.dot_dimension_numbers<[1], [0], [0], [1], [0, 0, 1, 1], [], []>} : vector<8x32xf32>, vector<32x128xf32>, vector<8x128xf32> -> vector<8x128xf32>
    %129 = arith.addf %127, %128 : vector<8x128xf32>
    %c32_46 = arith.constant 32 : index
    %c128_47 = arith.constant 128 : index
    %130 = vector.load %arg12[%c32_46, %c128_47] : memref<64x288xf32, #tpu.memory_space<vmem>>, vector<8x128xf32>
    %cst_48 = arith.constant dense<0.000000e+00> : vector<8x128xf32>
    %131 = tpu.matmul %124, %8, %cst_48 {dimension_numbers = #tpu.dot_dimension_numbers<[1], [0], [0], [1], [0, 0, 1, 1], [], []>} : vector<8x32xf32>, vector<32x128xf32>, vector<8x128xf32> -> vector<8x128xf32>
    %132 = arith.addf %130, %131 : vector<8x128xf32>
    %133 = arith.negf %129 : vector<8x128xf32>
    %134 = math.exp %133 : vector<8x128xf32>
    %cst_49 = arith.constant 1.000000e+00 : f32
    %135 = vector.broadcast %cst_49 : f32 to vector<8x128xf32>
    %136 = arith.addf %135, %134 : vector<8x128xf32>
    %137 = arith.divf %135, %136 : vector<8x128xf32>
    %138 = math.tanh %129 : vector<8x128xf32>
    %139 = vector.extract_strided_slice %137 {offsets = [0, 0], sizes = [8, 32], strides = [1, 1]} : vector<8x128xf32> to vector<8x32xf32>
    %140 = vector.extract_strided_slice %137 {offsets = [0, 32], sizes = [8, 32], strides = [1, 1]} : vector<8x128xf32> to vector<8x32xf32>
    %141 = vector.extract_strided_slice %138 {offsets = [0, 64], sizes = [8, 32], strides = [1, 1]} : vector<8x128xf32> to vector<8x32xf32>
    %142 = vector.extract_strided_slice %137 {offsets = [0, 96], sizes = [8, 32], strides = [1, 1]} : vector<8x128xf32> to vector<8x32xf32>
    %143 = arith.mulf %140, %107 : vector<8x32xf32>
    %144 = arith.mulf %139, %141 : vector<8x32xf32>
    %145 = arith.addf %143, %144 : vector<8x32xf32>
    %146 = math.tanh %145 : vector<8x32xf32>
    %147 = arith.mulf %142, %146 : vector<8x32xf32>
    %148 = arith.negf %132 : vector<8x128xf32>
    %149 = math.exp %148 : vector<8x128xf32>
    %cst_50 = arith.constant 1.000000e+00 : f32
    %150 = vector.broadcast %cst_50 : f32 to vector<8x128xf32>
    %151 = arith.addf %150, %149 : vector<8x128xf32>
    %152 = arith.divf %150, %151 : vector<8x128xf32>
    %153 = math.tanh %132 : vector<8x128xf32>
    %154 = vector.extract_strided_slice %152 {offsets = [0, 0], sizes = [8, 32], strides = [1, 1]} : vector<8x128xf32> to vector<8x32xf32>
    %155 = vector.extract_strided_slice %152 {offsets = [0, 32], sizes = [8, 32], strides = [1, 1]} : vector<8x128xf32> to vector<8x32xf32>
    %156 = vector.extract_strided_slice %153 {offsets = [0, 64], sizes = [8, 32], strides = [1, 1]} : vector<8x128xf32> to vector<8x32xf32>
    %157 = vector.extract_strided_slice %152 {offsets = [0, 96], sizes = [8, 32], strides = [1, 1]} : vector<8x128xf32> to vector<8x32xf32>
    %158 = arith.mulf %155, %122 : vector<8x32xf32>
    %159 = arith.mulf %154, %156 : vector<8x32xf32>
    %160 = arith.addf %158, %159 : vector<8x32xf32>
    %161 = math.tanh %160 : vector<8x32xf32>
    %162 = arith.mulf %157, %161 : vector<8x32xf32>
    %c24_51 = arith.constant 24 : index
    %c0_52 = arith.constant 0 : index
    %163 = vector.load %arg13[%c24_51, %c0_52] : memref<64x64xf32, #tpu.memory_space<vmem>>, vector<8x32xf32>
    tpu.vector_store %arg13[%c24_51, %c0_52], %147 {strides = array<i32>} : memref<64x64xf32, #tpu.memory_space<vmem>>, vector<8x32xf32>,
    %c32_53 = arith.constant 32 : index
    %c32_54 = arith.constant 32 : index
    %164 = vector.load %arg13[%c32_53, %c32_54] : memref<64x64xf32, #tpu.memory_space<vmem>>, vector<8x32xf32>
    tpu.vector_store %arg13[%c32_53, %c32_54], %162 {strides = array<i32>} : memref<64x64xf32, #tpu.memory_space<vmem>>, vector<8x32xf32>,
    %c32_55 = arith.constant 32 : index
    %c0_56 = arith.constant 0 : index
    %165 = vector.load %arg12[%c32_55, %c0_56] : memref<64x288xf32, #tpu.memory_space<vmem>>, vector<8x128xf32>
    %cst_57 = arith.constant dense<0.000000e+00> : vector<8x128xf32>
    %166 = tpu.matmul %147, %7, %cst_57 {dimension_numbers = #tpu.dot_dimension_numbers<[1], [0], [0], [1], [0, 0, 1, 1], [], []>} : vector<8x32xf32>, vector<32x128xf32>, vector<8x128xf32> -> vector<8x128xf32>
    %167 = arith.addf %165, %166 : vector<8x128xf32>
    %c24_58 = arith.constant 24 : index
    %c128_59 = arith.constant 128 : index
    %168 = vector.load %arg12[%c24_58, %c128_59] : memref<64x288xf32, #tpu.memory_space<vmem>>, vector<8x128xf32>
    %cst_60 = arith.constant dense<0.000000e+00> : vector<8x128xf32>
    %169 = tpu.matmul %162, %8, %cst_60 {dimension_numbers = #tpu.dot_dimension_numbers<[1], [0], [0], [1], [0, 0, 1, 1], [], []>} : vector<8x32xf32>, vector<32x128xf32>, vector<8x128xf32> -> vector<8x128xf32>
    %170 = arith.addf %168, %169 : vector<8x128xf32>
    %171 = arith.negf %167 : vector<8x128xf32>
    %172 = math.exp %171 : vector<8x128xf32>
    %cst_61 = arith.constant 1.000000e+00 : f32
    %173 = vector.broadcast %cst_61 : f32 to vector<8x128xf32>
    %174 = arith.addf %173, %172 : vector<8x128xf32>
    %175 = arith.divf %173, %174 : vector<8x128xf32>
    %176 = math.tanh %167 : vector<8x128xf32>
    %177 = vector.extract_strided_slice %175 {offsets = [0, 0], sizes = [8, 32], strides = [1, 1]} : vector<8x128xf32> to vector<8x32xf32>
    %178 = vector.extract_strided_slice %175 {offsets = [0, 32], sizes = [8, 32], strides = [1, 1]} : vector<8x128xf32> to vector<8x32xf32>
    %179 = vector.extract_strided_slice %176 {offsets = [0, 64], sizes = [8, 32], strides = [1, 1]} : vector<8x128xf32> to vector<8x32xf32>
    %180 = vector.extract_strided_slice %175 {offsets = [0, 96], sizes = [8, 32], strides = [1, 1]} : vector<8x128xf32> to vector<8x32xf32>
    %181 = arith.mulf %178, %145 : vector<8x32xf32>
    %182 = arith.mulf %177, %179 : vector<8x32xf32>
    %183 = arith.addf %181, %182 : vector<8x32xf32>
    %184 = math.tanh %183 : vector<8x32xf32>
    %185 = arith.mulf %180, %184 : vector<8x32xf32>
    %186 = arith.negf %170 : vector<8x128xf32>
    %187 = math.exp %186 : vector<8x128xf32>
    %cst_62 = arith.constant 1.000000e+00 : f32
    %188 = vector.broadcast %cst_62 : f32 to vector<8x128xf32>
    %189 = arith.addf %188, %187 : vector<8x128xf32>
    %190 = arith.divf %188, %189 : vector<8x128xf32>
    %191 = math.tanh %170 : vector<8x128xf32>
    %192 = vector.extract_strided_slice %190 {offsets = [0, 0], sizes = [8, 32], strides = [1, 1]} : vector<8x128xf32> to vector<8x32xf32>
    %193 = vector.extract_strided_slice %190 {offsets = [0, 32], sizes = [8, 32], strides = [1, 1]} : vector<8x128xf32> to vector<8x32xf32>
    %194 = vector.extract_strided_slice %191 {offsets = [0, 64], sizes = [8, 32], strides = [1, 1]} : vector<8x128xf32> to vector<8x32xf32>
    %195 = vector.extract_strided_slice %190 {offsets = [0, 96], sizes = [8, 32], strides = [1, 1]} : vector<8x128xf32> to vector<8x32xf32>
    %196 = arith.mulf %193, %160 : vector<8x32xf32>
    %197 = arith.mulf %192, %194 : vector<8x32xf32>
    %198 = arith.addf %196, %197 : vector<8x32xf32>
    %199 = math.tanh %198 : vector<8x32xf32>
    %200 = arith.mulf %195, %199 : vector<8x32xf32>
    %c32_63 = arith.constant 32 : index
    %c0_64 = arith.constant 0 : index
    %201 = vector.load %arg13[%c32_63, %c0_64] : memref<64x64xf32, #tpu.memory_space<vmem>>, vector<8x32xf32>
    tpu.vector_store %arg13[%c32_63, %c0_64], %185 {strides = array<i32>} : memref<64x64xf32, #tpu.memory_space<vmem>>, vector<8x32xf32>,
    %c24_65 = arith.constant 24 : index
    %c32_66 = arith.constant 32 : index
    %202 = vector.load %arg13[%c24_65, %c32_66] : memref<64x64xf32, #tpu.memory_space<vmem>>, vector<8x32xf32>
    tpu.vector_store %arg13[%c24_65, %c32_66], %200 {strides = array<i32>} : memref<64x64xf32, #tpu.memory_space<vmem>>, vector<8x32xf32>,
    %c40_67 = arith.constant 40 : index
    %c0_68 = arith.constant 0 : index
    %203 = vector.load %arg12[%c40_67, %c0_68] : memref<64x288xf32, #tpu.memory_space<vmem>>, vector<8x128xf32>
    %cst_69 = arith.constant dense<0.000000e+00> : vector<8x128xf32>
    %204 = tpu.matmul %185, %7, %cst_69 {dimension_numbers = #tpu.dot_dimension_numbers<[1], [0], [0], [1], [0, 0, 1, 1], [], []>} : vector<8x32xf32>, vector<32x128xf32>, vector<8x128xf32> -> vector<8x128xf32>
    %205 = arith.addf %203, %204 : vector<8x128xf32>
    %c16_70 = arith.constant 16 : index
    %c128_71 = arith.constant 128 : index
    %206 = vector.load %arg12[%c16_70, %c128_71] : memref<64x288xf32, #tpu.memory_space<vmem>>, vector<8x128xf32>
    %cst_72 = arith.constant dense<0.000000e+00> : vector<8x128xf32>
    %207 = tpu.matmul %200, %8, %cst_72 {dimension_numbers = #tpu.dot_dimension_numbers<[1], [0], [0], [1], [0, 0, 1, 1], [], []>} : vector<8x32xf32>, vector<32x128xf32>, vector<8x128xf32> -> vector<8x128xf32>
    %208 = arith.addf %206, %207 : vector<8x128xf32>
    %209 = arith.negf %205 : vector<8x128xf32>
    %210 = math.exp %209 : vector<8x128xf32>
    %cst_73 = arith.constant 1.000000e+00 : f32
    %211 = vector.broadcast %cst_73 : f32 to vector<8x128xf32>
    %212 = arith.addf %211, %210 : vector<8x128xf32>
    %213 = arith.divf %211, %212 : vector<8x128xf32>
    %214 = math.tanh %205 : vector<8x128xf32>
    %215 = vector.extract_strided_slice %213 {offsets = [0, 0], sizes = [8, 32], strides = [1, 1]} : vector<8x128xf32> to vector<8x32xf32>
    %216 = vector.extract_strided_slice %213 {offsets = [0, 32], sizes = [8, 32], strides = [1, 1]} : vector<8x128xf32> to vector<8x32xf32>
    %217 = vector.extract_strided_slice %214 {offsets = [0, 64], sizes = [8, 32], strides = [1, 1]} : vector<8x128xf32> to vector<8x32xf32>
    %218 = vector.extract_strided_slice %213 {offsets = [0, 96], sizes = [8, 32], strides = [1, 1]} : vector<8x128xf32> to vector<8x32xf32>
    %219 = arith.mulf %216, %183 : vector<8x32xf32>
    %220 = arith.mulf %215, %217 : vector<8x32xf32>
    %221 = arith.addf %219, %220 : vector<8x32xf32>
    %222 = math.tanh %221 : vector<8x32xf32>
    %223 = arith.mulf %218, %222 : vector<8x32xf32>
    %224 = arith.negf %208 : vector<8x128xf32>
    %225 = math.exp %224 : vector<8x128xf32>
    %cst_74 = arith.constant 1.000000e+00 : f32
    %226 = vector.broadcast %cst_74 : f32 to vector<8x128xf32>
    %227 = arith.addf %226, %225 : vector<8x128xf32>
    %228 = arith.divf %226, %227 : vector<8x128xf32>
    %229 = math.tanh %208 : vector<8x128xf32>
    %230 = vector.extract_strided_slice %228 {offsets = [0, 0], sizes = [8, 32], strides = [1, 1]} : vector<8x128xf32> to vector<8x32xf32>
    %231 = vector.extract_strided_slice %228 {offsets = [0, 32], sizes = [8, 32], strides = [1, 1]} : vector<8x128xf32> to vector<8x32xf32>
    %232 = vector.extract_strided_slice %229 {offsets = [0, 64], sizes = [8, 32], strides = [1, 1]} : vector<8x128xf32> to vector<8x32xf32>
    %233 = vector.extract_strided_slice %228 {offsets = [0, 96], sizes = [8, 32], strides = [1, 1]} : vector<8x128xf32> to vector<8x32xf32>
    %234 = arith.mulf %231, %198 : vector<8x32xf32>
    %235 = arith.mulf %230, %232 : vector<8x32xf32>
    %236 = arith.addf %234, %235 : vector<8x32xf32>
    %237 = math.tanh %236 : vector<8x32xf32>
    %238 = arith.mulf %233, %237 : vector<8x32xf32>
    %c40_75 = arith.constant 40 : index
    %c0_76 = arith.constant 0 : index
    %239 = vector.load %arg13[%c40_75, %c0_76] : memref<64x64xf32, #tpu.memory_space<vmem>>, vector<8x32xf32>
    tpu.vector_store %arg13[%c40_75, %c0_76], %223 {strides = array<i32>} : memref<64x64xf32, #tpu.memory_space<vmem>>, vector<8x32xf32>,
    %c16_77 = arith.constant 16 : index
    %c32_78 = arith.constant 32 : index
    %240 = vector.load %arg13[%c16_77, %c32_78] : memref<64x64xf32, #tpu.memory_space<vmem>>, vector<8x32xf32>
    tpu.vector_store %arg13[%c16_77, %c32_78], %238 {strides = array<i32>} : memref<64x64xf32, #tpu.memory_space<vmem>>, vector<8x32xf32>,
    %c48_79 = arith.constant 48 : index
    %c0_80 = arith.constant 0 : index
    %241 = vector.load %arg12[%c48_79, %c0_80] : memref<64x288xf32, #tpu.memory_space<vmem>>, vector<8x128xf32>
    %cst_81 = arith.constant dense<0.000000e+00> : vector<8x128xf32>
    %242 = tpu.matmul %223, %7, %cst_81 {dimension_numbers = #tpu.dot_dimension_numbers<[1], [0], [0], [1], [0, 0, 1, 1], [], []>} : vector<8x32xf32>, vector<32x128xf32>, vector<8x128xf32> -> vector<8x128xf32>
    %243 = arith.addf %241, %242 : vector<8x128xf32>
    %c8_82 = arith.constant 8 : index
    %c128_83 = arith.constant 128 : index
    %244 = vector.load %arg12[%c8_82, %c128_83] : memref<64x288xf32, #tpu.memory_space<vmem>>, vector<8x128xf32>
    %cst_84 = arith.constant dense<0.000000e+00> : vector<8x128xf32>
    %245 = tpu.matmul %238, %8, %cst_84 {dimension_numbers = #tpu.dot_dimension_numbers<[1], [0], [0], [1], [0, 0, 1, 1], [], []>} : vector<8x32xf32>, vector<32x128xf32>, vector<8x128xf32> -> vector<8x128xf32>
    %246 = arith.addf %244, %245 : vector<8x128xf32>
    %247 = arith.negf %243 : vector<8x128xf32>
    %248 = math.exp %247 : vector<8x128xf32>
    %cst_85 = arith.constant 1.000000e+00 : f32
    %249 = vector.broadcast %cst_85 : f32 to vector<8x128xf32>
    %250 = arith.addf %249, %248 : vector<8x128xf32>
    %251 = arith.divf %249, %250 : vector<8x128xf32>
    %252 = math.tanh %243 : vector<8x128xf32>
    %253 = vector.extract_strided_slice %251 {offsets = [0, 0], sizes = [8, 32], strides = [1, 1]} : vector<8x128xf32> to vector<8x32xf32>
    %254 = vector.extract_strided_slice %251 {offsets = [0, 32], sizes = [8, 32], strides = [1, 1]} : vector<8x128xf32> to vector<8x32xf32>
    %255 = vector.extract_strided_slice %252 {offsets = [0, 64], sizes = [8, 32], strides = [1, 1]} : vector<8x128xf32> to vector<8x32xf32>
    %256 = vector.extract_strided_slice %251 {offsets = [0, 96], sizes = [8, 32], strides = [1, 1]} : vector<8x128xf32> to vector<8x32xf32>
    %257 = arith.mulf %254, %221 : vector<8x32xf32>
    %258 = arith.mulf %253, %255 : vector<8x32xf32>
    %259 = arith.addf %257, %258 : vector<8x32xf32>
    %260 = math.tanh %259 : vector<8x32xf32>
    %261 = arith.mulf %256, %260 : vector<8x32xf32>
    %262 = arith.negf %246 : vector<8x128xf32>
    %263 = math.exp %262 : vector<8x128xf32>
    %cst_86 = arith.constant 1.000000e+00 : f32
    %264 = vector.broadcast %cst_86 : f32 to vector<8x128xf32>
    %265 = arith.addf %264, %263 : vector<8x128xf32>
    %266 = arith.divf %264, %265 : vector<8x128xf32>
    %267 = math.tanh %246 : vector<8x128xf32>
    %268 = vector.extract_strided_slice %266 {offsets = [0, 0], sizes = [8, 32], strides = [1, 1]} : vector<8x128xf32> to vector<8x32xf32>
    %269 = vector.extract_strided_slice %266 {offsets = [0, 32], sizes = [8, 32], strides = [1, 1]} : vector<8x128xf32> to vector<8x32xf32>
    %270 = vector.extract_strided_slice %267 {offsets = [0, 64], sizes = [8, 32], strides = [1, 1]} : vector<8x128xf32> to vector<8x32xf32>
    %271 = vector.extract_strided_slice %266 {offsets = [0, 96], sizes = [8, 32], strides = [1, 1]} : vector<8x128xf32> to vector<8x32xf32>
    %272 = arith.mulf %269, %236 : vector<8x32xf32>
    %273 = arith.mulf %268, %270 : vector<8x32xf32>
    %274 = arith.addf %272, %273 : vector<8x32xf32>
    %275 = math.tanh %274 : vector<8x32xf32>
    %276 = arith.mulf %271, %275 : vector<8x32xf32>
    %c48_87 = arith.constant 48 : index
    %c0_88 = arith.constant 0 : index
    %277 = vector.load %arg13[%c48_87, %c0_88] : memref<64x64xf32, #tpu.memory_space<vmem>>, vector<8x32xf32>
    tpu.vector_store %arg13[%c48_87, %c0_88], %261 {strides = array<i32>} : memref<64x64xf32, #tpu.memory_space<vmem>>, vector<8x32xf32>,
    %c8_89 = arith.constant 8 : index
    %c32_90 = arith.constant 32 : index
    %278 = vector.load %arg13[%c8_89, %c32_90] : memref<64x64xf32, #tpu.memory_space<vmem>>, vector<8x32xf32>
    tpu.vector_store %arg13[%c8_89, %c32_90], %276 {strides = array<i32>} : memref<64x64xf32, #tpu.memory_space<vmem>>, vector<8x32xf32>,
    %c56_91 = arith.constant 56 : index
    %c0_92 = arith.constant 0 : index
    %279 = vector.load %arg12[%c56_91, %c0_92] : memref<64x288xf32, #tpu.memory_space<vmem>>, vector<8x128xf32>
    %cst_93 = arith.constant dense<0.000000e+00> : vector<8x128xf32>
    %280 = tpu.matmul %261, %7, %cst_93 {dimension_numbers = #tpu.dot_dimension_numbers<[1], [0], [0], [1], [0, 0, 1, 1], [], []>} : vector<8x32xf32>, vector<32x128xf32>, vector<8x128xf32> -> vector<8x128xf32>
    %281 = arith.addf %279, %280 : vector<8x128xf32>
    %c0_94 = arith.constant 0 : index
    %c128_95 = arith.constant 128 : index
    %282 = vector.load %arg12[%c0_94, %c128_95] : memref<64x288xf32, #tpu.memory_space<vmem>>, vector<8x128xf32>
    %cst_96 = arith.constant dense<0.000000e+00> : vector<8x128xf32>
    %283 = tpu.matmul %276, %8, %cst_96 {dimension_numbers = #tpu.dot_dimension_numbers<[1], [0], [0], [1], [0, 0, 1, 1], [], []>} : vector<8x32xf32>, vector<32x128xf32>, vector<8x128xf32> -> vector<8x128xf32>
    %284 = arith.addf %282, %283 : vector<8x128xf32>
    %285 = arith.negf %281 : vector<8x128xf32>
    %286 = math.exp %285 : vector<8x128xf32>
    %cst_97 = arith.constant 1.000000e+00 : f32
    %287 = vector.broadcast %cst_97 : f32 to vector<8x128xf32>
    %288 = arith.addf %287, %286 : vector<8x128xf32>
    %289 = arith.divf %287, %288 : vector<8x128xf32>
    %290 = math.tanh %281 : vector<8x128xf32>
    %291 = vector.extract_strided_slice %289 {offsets = [0, 0], sizes = [8, 32], strides = [1, 1]} : vector<8x128xf32> to vector<8x32xf32>
    %292 = vector.extract_strided_slice %289 {offsets = [0, 32], sizes = [8, 32], strides = [1, 1]} : vector<8x128xf32> to vector<8x32xf32>
    %293 = vector.extract_strided_slice %290 {offsets = [0, 64], sizes = [8, 32], strides = [1, 1]} : vector<8x128xf32> to vector<8x32xf32>
    %294 = vector.extract_strided_slice %289 {offsets = [0, 96], sizes = [8, 32], strides = [1, 1]} : vector<8x128xf32> to vector<8x32xf32>
    %295 = arith.mulf %292, %259 : vector<8x32xf32>
    %296 = arith.mulf %291, %293 : vector<8x32xf32>
    %297 = arith.addf %295, %296 : vector<8x32xf32>
    %298 = math.tanh %297 : vector<8x32xf32>
    %299 = arith.mulf %294, %298 : vector<8x32xf32>
    %300 = arith.negf %284 : vector<8x128xf32>
    %301 = math.exp %300 : vector<8x128xf32>
    %cst_98 = arith.constant 1.000000e+00 : f32
    %302 = vector.broadcast %cst_98 : f32 to vector<8x128xf32>
    %303 = arith.addf %302, %301 : vector<8x128xf32>
    %304 = arith.divf %302, %303 : vector<8x128xf32>
    %305 = math.tanh %284 : vector<8x128xf32>
    %306 = vector.extract_strided_slice %304 {offsets = [0, 0], sizes = [8, 32], strides = [1, 1]} : vector<8x128xf32> to vector<8x32xf32>
    %307 = vector.extract_strided_slice %304 {offsets = [0, 32], sizes = [8, 32], strides = [1, 1]} : vector<8x128xf32> to vector<8x32xf32>
    %308 = vector.extract_strided_slice %305 {offsets = [0, 64], sizes = [8, 32], strides = [1, 1]} : vector<8x128xf32> to vector<8x32xf32>
    %309 = vector.extract_strided_slice %304 {offsets = [0, 96], sizes = [8, 32], strides = [1, 1]} : vector<8x128xf32> to vector<8x32xf32>
    %310 = arith.mulf %307, %274 : vector<8x32xf32>
    %311 = arith.mulf %306, %308 : vector<8x32xf32>
    %312 = arith.addf %310, %311 : vector<8x32xf32>
    %313 = math.tanh %312 : vector<8x32xf32>
    %314 = arith.mulf %309, %313 : vector<8x32xf32>
    %c56_99 = arith.constant 56 : index
    %c0_100 = arith.constant 0 : index
    %315 = vector.load %arg13[%c56_99, %c0_100] : memref<64x64xf32, #tpu.memory_space<vmem>>, vector<8x32xf32>
    tpu.vector_store %arg13[%c56_99, %c0_100], %299 {strides = array<i32>} : memref<64x64xf32, #tpu.memory_space<vmem>>, vector<8x32xf32>,
    %c0_101 = arith.constant 0 : index
    %c32_102 = arith.constant 32 : index
    %316 = vector.load %arg13[%c0_101, %c32_102] : memref<64x64xf32, #tpu.memory_space<vmem>>, vector<8x32xf32>
    tpu.vector_store %arg13[%c0_101, %c32_102], %314 {strides = array<i32>} : memref<64x64xf32, #tpu.memory_space<vmem>>, vector<8x32xf32>,
    %c0_103 = arith.constant 0 : index
    %c0_104 = arith.constant 0 : index
    %317 = vector.load %arg13[%c0_103, %c0_104] : memref<64x64xf32, #tpu.memory_space<vmem>>, vector<64x64xf32>
    %c0_105 = arith.constant 0 : index
    %c0_106 = arith.constant 0 : index
    %318 = vector.load %arg5[%c0_105, %c0_106] : memref<64x32xf32, #tpu.memory_space<vmem>>, vector<64x32xf32>
    %cst_107 = arith.constant dense<0.000000e+00> : vector<64x32xf32>
    %319 = tpu.matmul %317, %318, %cst_107 {dimension_numbers = #tpu.dot_dimension_numbers<[1], [0], [0], [1], [0, 0, 1, 1], [], []>} : vector<64x64xf32>, vector<64x32xf32>, vector<64x32xf32> -> vector<64x32xf32>
    %c0_108 = arith.constant 0 : index
    %c256 = arith.constant 256 : index
    %320 = vector.load %arg12[%c0_108, %c256] : memref<64x288xf32, #tpu.memory_space<vmem>>, vector<64x32xf32>
    %321 = arith.addf %319, %320 : vector<64x32xf32>
    %322 = math.tanh %321 : vector<64x32xf32>
    %323 = vector.extract_strided_slice %322 {offsets = [0, 0], sizes = [8, 32], strides = [1, 1]} : vector<64x32xf32> to vector<8x32xf32>
    %324 = vector.extract_strided_slice %322 {offsets = [8, 0], sizes = [8, 32], strides = [1, 1]} : vector<64x32xf32> to vector<8x32xf32>
    %325 = arith.maximumf %323, %324 : vector<8x32xf32>
    %326 = vector.extract_strided_slice %322 {offsets = [16, 0], sizes = [8, 32], strides = [1, 1]} : vector<64x32xf32> to vector<8x32xf32>
    %327 = arith.maximumf %325, %326 : vector<8x32xf32>
    %328 = vector.extract_strided_slice %322 {offsets = [24, 0], sizes = [8, 32], strides = [1, 1]} : vector<64x32xf32> to vector<8x32xf32>
    %329 = arith.maximumf %327, %328 : vector<8x32xf32>
    %330 = vector.extract_strided_slice %322 {offsets = [32, 0], sizes = [8, 32], strides = [1, 1]} : vector<64x32xf32> to vector<8x32xf32>
    %331 = arith.maximumf %329, %330 : vector<8x32xf32>
    %332 = vector.extract_strided_slice %322 {offsets = [40, 0], sizes = [8, 32], strides = [1, 1]} : vector<64x32xf32> to vector<8x32xf32>
    %333 = arith.maximumf %331, %332 : vector<8x32xf32>
    %334 = vector.extract_strided_slice %322 {offsets = [48, 0], sizes = [8, 32], strides = [1, 1]} : vector<64x32xf32> to vector<8x32xf32>
    %335 = arith.maximumf %333, %334 : vector<8x32xf32>
    %336 = vector.extract_strided_slice %322 {offsets = [56, 0], sizes = [8, 32], strides = [1, 1]} : vector<64x32xf32> to vector<8x32xf32>
    %337 = arith.maximumf %335, %336 : vector<8x32xf32>
    %c0_109 = arith.constant 0 : index
    %c0_110 = arith.constant 0 : index
    %338 = vector.load %arg6[%c0_109, %c0_110] : memref<32x256xf32, #tpu.memory_space<vmem>>, vector<32x256xf32>
    %cst_111 = arith.constant dense<0.000000e+00> : vector<8x256xf32>
    %339 = tpu.matmul %337, %338, %cst_111 {dimension_numbers = #tpu.dot_dimension_numbers<[1], [0], [0], [1], [0, 0, 1, 1], [], []>} : vector<8x32xf32>, vector<32x256xf32>, vector<8x256xf32> -> vector<8x256xf32>
    %c0_112 = arith.constant 0 : index
    %c0_113 = arith.constant 0 : index
    %340 = vector.load %arg7[%c0_112, %c0_113] : memref<1x256xf32, #tpu.memory_space<vmem>>, vector<1x256xf32>
    %341 = vector.broadcast %340 : vector<1x256xf32> to vector<8x256xf32>
    %342 = arith.addf %339, %341 : vector<8x256xf32>
    %c0_114 = arith.constant 0 : index
    %c0_115 = arith.constant 0 : index
    %343 = vector.load %arg8[%c0_114, %c0_115] : memref<256x128xf32, #tpu.memory_space<vmem>>, vector<256x128xf32>
    %cst_116 = arith.constant dense<0.000000e+00> : vector<8x128xf32>
    %344 = tpu.matmul %342, %343, %cst_116 {dimension_numbers = #tpu.dot_dimension_numbers<[1], [0], [0], [1], [0, 0, 1, 1], [], []>} : vector<8x256xf32>, vector<256x128xf32>, vector<8x128xf32> -> vector<8x128xf32>
    %c0_117 = arith.constant 0 : index
    %c0_118 = arith.constant 0 : index
    %345 = vector.load %arg9[%c0_117, %c0_118] : memref<1x128xf32, #tpu.memory_space<vmem>>, vector<1x128xf32>
    %346 = vector.broadcast %345 : vector<1x128xf32> to vector<8x128xf32>
    %347 = arith.addf %344, %346 : vector<8x128xf32>
    %c0_119 = arith.constant 0 : index
    %c0_120 = arith.constant 0 : index
    %348 = vector.load %arg10[%c0_119, %c0_120] : memref<8x256xf32, #tpu.memory_space<vmem>>, vector<8x256xf32>
    tpu.vector_store %arg10[%c0_119, %c0_120], %342 {strides = array<i32>} : memref<8x256xf32, #tpu.memory_space<vmem>>, vector<8x256xf32>,
    %c0_121 = arith.constant 0 : index
    %c0_122 = arith.constant 0 : index
    %349 = vector.load %arg11[%c0_121, %c0_122] : memref<8x128xf32, #tpu.memory_space<vmem>>, vector<8x128xf32>
    tpu.vector_store %arg11[%c0_121, %c0_122], %347 {strides = array<i32>} : memref<8x128xf32, #tpu.memory_space<vmem>>, vector<8x128xf32>,
    return
  }
}

</mosaic_0001>

<bundles_post_ra>
// kernel: lstmcnn_forward.1
= control target key start
LH: loop header
LB: loop body
LE: loop exit
PB: predicated region body
PF: predicated region fallthrough
CT: control target
= control target key end

     0   :  { %v3115_v3 = vmov 0.0   ;;  %vm68_vm0 = vcmask 130048   ;;  %v3116_v15 = vmov 0.0|0.0   ;;  %vm3117_vm1 = vmmov 0   ;;  %s3119_s20 = smov 32   ;;  %s3758_s1 = inlined_call_operand.vmem [shape: f32[16,288], index: 1, kind: input, shape index: {}]   ;;  %s3759_s0 = inlined_call_operand.vmem [shape: f32[64,16], index: 0, kind: input, shape index: {}]   ;;  %s3760_s3 = inlined_call_operand.vmem [shape: f32[32,128], index: 3, kind: input, shape index: {}]   ;;  %s3761_s4 = inlined_call_operand.vmem [shape: f32[32,128], index: 4, kind: input, shape index: {}]   ;;  %s3762_s2 = inlined_call_operand.vmem [shape: f32[1,288], index: 2, kind: input, shape index: {}]   ;;  %s3763_s5 = inlined_call_operand.vmem [shape: f32[64,32], index: 5, kind: input, shape index: {}]   ;;  %s3764_s6 = inlined_call_operand.vmem [shape: f32[32,256], index: 6, kind: input, shape index: {}]   ;;  %s3765_s8 = inlined_call_operand.vmem [shape: f32[256,128], index: 8, kind: input, shape index: {}]   ;;  %s3766_s7 = inlined_call_operand.vmem [shape: f32[1,256], index: 7, kind: input, shape index: {}]   ;;  %s3767_s10 = inlined_call_operand.vmem [shape: f32[8,256], index: 10, kind: output, shape index: {0}]   ;;  %s3768_s9 = inlined_call_operand.vmem [shape: f32[1,128], index: 9, kind: input, shape index: {}]   ;;  %s3769_s11 = inlined_call_operand.vmem [shape: f32[8,128], index: 11, kind: output, shape index: {1}]  }
   0x1   :  { %v46_v0 = vld [vmem:[%s3758_s1 + $0x8] sm:$0xff]  ;;  %v49_v1 = vld [vmem:[%s3758_s1 + $0x20] sm:$0xff]  ;;  %v47_v2 = vld [vmem:[%s3758_s1 + $0x10] sm:$0xff]  ;;  %157 = vmatprep.mubr.f32.mxu0 %v3115_v3  ;;  %v53_v31 = vlaneseq  ;;  %vm313_vm2 = vcmask 261120   ;;  %vm548_vm3 = vcmask 523520   ;;  %vm2030_vm4 = vcmask 523264  }
   0x2   :  { %v2806_v4 = vpack.c.bf16 %v49_v1, %v46_v0  ;;  %v50_v5 = vld [vmem:[%s3758_s1 + $0x28] sm:$0xff]  ;;  %v45_v6 = vld [vmem:[%s3758_s1] sm:$0xff]  ;;  %v48_v7 = vld [vmem:[%s3758_s1 + $0x18] sm:$0xff] }
   0x3   :  { %v2810_v8 = vpack.c.bf16 %v50_v5, %v47_v2  ;;  %v2808_v9 = vpack.c.bf16 %v48_v7, %v45_v6  ;;  %v37_v10 = vld [vmem:[%s3759_s0] sm:$0xff]  ;;  %v337_v12 = vld [vmem:[%s3760_s3 + $0x8] sm:$0xff]  ;;  %v39_v16 = vld [vmem:[%s3759_s0 + $0x10] sm:$0xff]  ;;  %v3306_v32 = vshrl.u32 %v53_v31, 7 }
   0x4   :  { %2807 = vmatprep.subr.bf16.mxu0 %v2806_v4  ;;  %2590 = vmatprep.mubr.msk.f32.mxu1 %vm68_vm0, %v37_v10  ;;  %v336_v11 = vld [vmem:[%s3760_s3] sm:$0xff]  ;;  %v38_v13 = vld [vmem:[%s3759_s0 + $0x8] sm:$0xff]  ;;  %v338_v17 = vld [vmem:[%s3760_s3 + $0x10] sm:$0xff] }
   0x5   :  { %2811 = vmatprep.subr.bf16.mxu1 %v2810_v8  ;;  %2809 = vmatpush1.bf16.msra.mxu0 %v2808_v9  ;;  %v3212_v14 = vpack.c.bf16 %v337_v12, %v336_v11  ;;  %v339_v18 = vld [vmem:[%s3760_s3 + $0x18] sm:$0xff]  ;;  %v41_v21 = vld [vmem:[%s3759_s0 + $0x20] sm:$0xff]  ;;  %v42_v22 = vld [vmem:[%s3759_s0 + $0x28] sm:$0xff]  ;;  %v55_v33 = vsub.s32 0, %v3306_v32  ;;  %v59_v35 = vsub.s32 1, %v3306_v32  ;;  %v63_v36 = vsub.s32 2, %v3306_v32 }
   0x6   :  { %2813 = vmatpush3.bf16.msra.mxu1 %v2810_v8  ;;  %2826 = vmatprep.subr.bf16.mxu0 %v3116_v15  ;;  %v40_v19 = vld [vmem:[%s3759_s0 + $0x18] sm:$0xff]  ;;  %v3233_v20 = vpack.c.bf16 %v339_v18, %v338_v17  ;;  %v43_v23 = vld [vmem:[%s3759_s0 + $0x30] sm:$0xff]  ;;  %v340_v25 = vld [vmem:[%s3761_s4] sm:$0xff] }
   0x7   :  { %2814 = vmatprep.subr.bf16.mxu1 %v3116_v15  ;;  %v44_v24 = vld [vmem:[%s3759_s0 + $0x38] sm:$0xff]  ;;  %v341_v26 = vld [vmem:[%s3761_s4 + $0x8] sm:$0xff]  ;;  %v342_v28 = vld [vmem:[%s3761_s4 + $0x10] sm:$0xff] }
   0x8   :  { %2389 = vmatmul.mubr.msk.f32.vlgmr.msra.gmra.mrb[0].mxu0 %vm68_vm0, %v37_v10  ;;  %v3273_v27 = vpack.c.bf16 %v341_v26, %v340_v25  ;;  %v343_v29 = vld [vmem:[%s3761_s4 + $0x18] sm:$0xff]  ;;  %v51_v34 = vld [vmem:[%s3762_s2] sm:$0x7]  ;;  %s3118_s2 = smov 64  }
   0x9   :  { %2591 = vmatmul.mubr.msk.f32.vlgmr.msra.gmra.mrb[0].mxu1 %vm68_vm0, %v38_v13  ;;  %163 = vmatprep.mubr.f32.mxu0 %v3115_v3  ;;  %v3285_v30 = vpack.c.bf16 %v343_v29, %v342_v28  ;;  %v56_v37 = vrot.slane %v51_v34, %v55_v33  ;;  %v3318_v38 = vrot.slane %v51_v34, %v59_v35  ;;  %v2444_v32 = vld [vmem:[%s3768_s9] ss:$0 sm:$0xff] }
   0xa   :  { %2593 = vmatprep.mubr.msk.f32.mxu1 %vm68_vm0, %v39_v16  ;;  %2816 = vmatpush3.bf16.msra.mxu1 %v3212_v14  ;;  %v64_v39 = vrot.slane %v51_v34, %v63_v36 }
   0xb   :  { %2817 = vmatprep.subr.bf16.mxu1 %v3116_v15  ;;  %2828 = vmatpush3.bf16.msra.mxu0 %v3212_v14 }
   0xc   :  { %2390 = vmatmul.mubr.msk.f32.gmra.mrb[2].mxu0 %vm68_vm0, %v38_v13  ;;  %2829 = vmatprep.subr.bf16.mxu0 %v3116_v15 }
   0xd   :  { %2594 = vmatmul.mubr.msk.f32.gmra.mrb[2].mxu1 %vm68_vm0, %v40_v19  ;;  %169 = vmatprep.mubr.f32.mxu0 %v3115_v3 }
   0xe   :  { %2596 = vmatprep.mubr.msk.f32.mxu1 %vm68_vm0, %v41_v21  ;;  %2819 = vmatpush3.bf16.msra.mxu1 %v3233_v20 }
   0xf   :  { %2820 = vmatprep.subr.bf16.mxu1 %v3116_v15  ;;  %2831 = vmatpush3.bf16.msra.mxu0 %v3233_v20 }
  0x10   :  { %2391 = vmatmul.mubr.msk.f32.gmra.mrb[4].mxu0 %vm68_vm0, %v39_v16  ;;  %2838 = vmatprep.subr.bf16.mxu0 %v3116_v15 }
  0x11   :  { %2597 = vmatmul.mubr.msk.f32.gmra.mrb[4].mxu1 %vm68_vm0, %v42_v22  ;;  %175 = vmatprep.mubr.f32.mxu0 %v3115_v3 }
  0x12   :  { %2599 = vmatprep.mubr.msk.f32.mxu1 %vm68_vm0, %v43_v23 }
  0x14   :  { %2392 = vmatmul.mubr.msk.f32.gmra.mrb[6].mxu0 %vm68_vm0, %v40_v19 }
  0x15   :  { %2600 = vmatmul.mubr.msk.f32.gmra.mrb[6].mxu1 %vm68_vm0, %v44_v24  ;;  %181 = vmatprep.mubr.f32.mxu0 %v3115_v3 }
  0x16   :  { %2610 = vmatprep.mubr.msk.f32.mxu1 %vm3117_vm1, %v3115_v3 }
  0x18   :  { %2393 = vmatmul.mubr.msk.f32.gmra.mrb[8].mxu0 %vm68_vm0, %v41_v21 }
  0x19   :  { %2611 = vmatmul.mubr.f32.vlgmr.msra.gmra.mrb[8].mxu1 %v3115_v3  ;;  %187 = vmatprep.mubr.f32.mxu0 %v3115_v3 }
  0x1a   :  { %2822 = vmatpush3.bf16.msra.mxu1 %v3273_v27  ;;  %2621 = vmatprep.mubr.msk.f32.mxu1 %vm3117_vm1, %v3115_v3 }
  0x1b   :  { %2823 = vmatprep.subr.bf16.mxu1 %v3116_v15 }
  0x1c   :  { %2394 = vmatmul.mubr.msk.f32.gmra.mrb[10].mxu0 %vm68_vm0, %v42_v22 }
  0x1d   :  { %193 = vmatprep.mubr.f32.mxu0 %v3115_v3 }
  0x1e   :  { %2825 = vmatpush3.bf16.msra.mxu1 %v3285_v30 }
  0x1f   :  { %2832 = vmatprep.subr.bf16.mxu1 %v3116_v15 }
  0x20   :  { %2395 = vmatmul.mubr.msk.f32.gmra.mrb[12].mxu0 %vm68_vm0, %v43_v23 }
  0x21   :  { %199 = vmatprep.mubr.f32.mxu0 %v3115_v3  ;;  %2622 = vmatmul.mubr.f32.vlgmr.msra.gmra.mrb[10].mxu1 %v3115_v3 }
  0x22   :  { %2834 = vmatpush3.bf16.msra.mxu1 %v3273_v27  ;;  %2643 = vmatprep.mubr.msk.f32.mxu1 %vm3117_vm1, %v3115_v3 }
  0x23   :  { %2835 = vmatprep.subr.bf16.mxu1 %v3116_v15 }
  0x24   :  { %2396 = vmatmul.mubr.msk.f32.gmra.mrb[14].mxu0 %vm68_vm0, %v44_v24 }
  0x25   :  { %2632 = vmatprep.mubr.msk.f32.mxu0 %vm3117_vm1, %v3115_v3 }
  0x26   :  { %2837 = vmatpush3.bf16.msra.mxu1 %v3285_v30 }
  0x27   :  { %2844 = vmatprep.subr.bf16.mxu1 %v3116_v15 }
  0xdb   :  { %v159_v40 = vpop.f32.mrb[0].mxu0 }
  0xdc   :  { %v160_v41 = vadd.f32 %v159_v40, %v56_v37  ;;  %v161_v42 = vpop.f32.mrb[1].mxu0  ;;  %v2592_v43 = vpop.f32.mrb[0].mxu1 }
  0xdd   :  { %v3321_v44 = vadd.f32 %v161_v42, %v3318_v38  ;;  %v278_v45 = vadd.f32 %v2592_v43, %v64_v39  ;;  %v272_v46 = vpop.f32.mrb[1].mxu1 }
  0xde   :  { %v273_v47 = vadd.f32 %v272_v46, %v64_v39 }
  0xdf   :  { %v165_v48 = vpop.f32.mrb[2].mxu0  ;;  %317 = vst.msk [vmem:[#allocation2 + $0x28] sm:$0xff] %vm313_vm2, %v278_v45 }
  0xe0   :  { %v3324_v49 = vadd.f32 %v165_v48, %v56_v37  ;;  %v167_v50 = vpop.f32.mrb[3].mxu0  ;;  %314 = vst.msk [vmem:[#allocation2 + $0x10] sm:$0xff] %vm313_vm2, %v273_v47  ;;  %v2595_v51 = vpop.f32.mrb[2].mxu1 }
  0xe1   :  { %v3328_v52 = vadd.f32 %v167_v50, %v3318_v38  ;;  %v288_v53 = vadd.f32 %v2595_v51, %v64_v39  ;;  %v282_v54 = vpop.f32.mrb[3].mxu1 }
  0xe2   :  { %v283_v55 = vadd.f32 %v282_v54, %v64_v39 }
  0xe3   :  { %v171_v56 = vpop.f32.mrb[4].mxu0  ;;  %323 = vst.msk [vmem:[#allocation2 + $0x58] sm:$0xff] %vm313_vm2, %v288_v53 }
  0xe4   :  { %v3331_v57 = vadd.f32 %v171_v56, %v56_v37  ;;  %v173_v58 = vpop.f32.mrb[5].mxu0  ;;  %320 = vst.msk [vmem:[#allocation2 + $0x40] sm:$0xff] %vm313_vm2, %v283_v55  ;;  %v2598_v59 = vpop.f32.mrb[4].mxu1 }
  0xe5   :  { %v3335_v60 = vadd.f32 %v173_v58, %v3318_v38  ;;  %v298_v61 = vadd.f32 %v2598_v59, %v64_v39  ;;  %v292_v62 = vpop.f32.mrb[5].mxu1 }
  0xe6   :  { %v293_v63 = vadd.f32 %v292_v62, %v64_v39 }
  0xe7   :  { %v177_v0 = vpop.f32.mrb[6].mxu0  ;;  %329 = vst.msk [vmem:[#allocation2 + $0x88] sm:$0xff] %vm313_vm2, %v298_v61 }
  0xe8   :  { %v3338_v1 = vadd.f32 %v177_v0, %v56_v37  ;;  %v179_v2 = vpop.f32.mrb[7].mxu0  ;;  %326 = vst.msk [vmem:[#allocation2 + $0x70] sm:$0xff] %vm313_vm2, %v293_v63  ;;  %v2601_v4 = vpop.f32.mrb[6].mxu1 }
  0xe9   :  { %v3342_v5 = vadd.f32 %v179_v2, %v3318_v38  ;;  %v308_v6 = vadd.f32 %v2601_v4, %v64_v39  ;;  %v302_v7 = vpop.f32.mrb[7].mxu1 }
  0xea   :  { %v303_v8 = vadd.f32 %v302_v7, %v64_v39 }
  0xeb   :  { %335 = vst.msk [vmem:[#allocation2 + $0xb8] sm:$0xff] %vm313_vm2, %v308_v6  ;;  %v183_v9 = vpop.f32.mrb[8].mxu0 }
  0xec   :  { %332 = vst.msk [vmem:[#allocation2 + $0xa0] sm:$0xff] %vm313_vm2, %v303_v8  ;;  %v3346_v10 = vadd.f32 %v183_v9, %v56_v37  ;;  %v414_v11 = vpop.f32.mrb[8].mxu1  ;;  %v185_v12 = vpop.f32.mrb[9].mxu0 }
  0xed   :  { %v418_v13 = vadd.f32 %v414_v11, %v160_v41  ;;  %v3349_v16 = vadd.f32 %v185_v12, %v3318_v38  ;;  %v2612_v17 = vpop.f32.mrb[9].mxu1 }
  0xef   :  { %v189_v18 = vpop.f32.mrb[10].mxu0  ;;  %v2405_v45 = vmul.f32 -1.442695, %v418_v13 }
  0xf0   :  { %v3351_v19 = vadd.f32 %v189_v18, %v56_v37  ;;  %v191_v21 = vpop.f32.mrb[11].mxu0 }
  0xf1   :  { %v3354_v22 = vadd.f32 %v191_v21, %v3318_v38 }
  0xf3   :  { %v195_v23 = vpop.f32.mrb[12].mxu0 }
  0xf4   :  { %v3356_v24 = vadd.f32 %v195_v23, %v56_v37  ;;  %v197_v25 = vpop.f32.mrb[13].mxu0  ;;  %v486_v26 = vpop.f32.mrb[10].mxu1 }
  0xf5   :  { %v3359_v28 = vadd.f32 %v197_v25, %v3318_v38  ;;  %v2623_v29 = vpop.f32.mrb[11].mxu1 }
  0xf7   :  { %v201_v31 = vpop.f32.mrb[14].mxu0 }
  0xf8   :  { %v3361_v34 = vadd.f32 %v201_v31, %v56_v37  ;;  %v203_v36 = vpop.f32.mrb[15].mxu0 }
  0xf9   :  { %v204_v39 = vadd.f32 %v203_v36, %v3318_v38 }
  0xfb   :  { %v490_v40 = vadd.f32 %v486_v26, %v204_v39 }
  0xfd   :  { %2971 = vtanh.f32 %v490_v40  ;;  %v2406_v43 = vmul.f32 -1.442695, %v490_v40 }
  0xfe   :  { %2973 = vtanh.f32 %v418_v13 }
  0xff   :  { %2975 = vpow2.f32 %v2406_v43 }
 0x100   :  { %2977 = vpow2.f32 %v2405_v45 }
 0x107   :  { %v2972_v41 = vpop.eup %2971 }
 0x108   :  { %524 = vrot.lane.b32.xlu0 %v2972_v41, %s3118_s2  ;;  %v2974_v42 = vpop.eup %2973 }
 0x109   :  { %v2976_v46 = vpop.eup %2975 }
 0x10a   :  { %v518_v37 = vadd.f32 1.0, %v2976_v46  ;;  %v2978_v47 = vpop.eup %2977 }
 0x10b   :  { %v494_v48 = vadd.f32 1.0, %v2978_v47 }
 0x10c   :  { %500 = vrot.lane.b32.xlu0 %v2974_v42, %s3118_s2  ;;  %2979 = vrcp.f32 %v518_v37 }
 0x10d   :  { %2981 = vrcp.f32 %v494_v48 }
 0x116   :  { %v2980_v38 = vpop.eup %2979 }
 0x117   :  { %v2982_v53 = vpop.eup %2981  ;;  %v522_v56 = vmul.f32 0.0, %v2980_v38 }
 0x118   :  { %v498_v61 = vmul.f32 0.0, %v2982_v53 }
 0x17a   :  { %v525_v50 = vpop.permute.xlu0 %524 }
 0x17b   :  { %v527_v51 = vmul.f32 %v2980_v38, %v525_v50 }
 0x17d   :  { %529 = vrot.lane.b32.xlu1 %v527_v51, %s3119_s20 }
 0x17e   :  { %v501_v54 = vpop.permute.xlu0 %500 }
 0x17f   :  { %v503_v55 = vmul.f32 %v2982_v53, %v501_v54 }
 0x181   :  { %505 = vrot.lane.b32.xlu1 %v503_v55, %s3119_s20 }
 0x1ef   :  { %v530_v58 = vpop.permute.xlu1 %529 }
 0x1f0   :  { %v532_v59 = vadd.f32 %v530_v58, %v522_v56 }
 0x1f2   :  { %2983 = vtanh.f32 %v532_v59 }
 0x1f3   :  { %v506_v62 = vpop.permute.xlu1 %505 }
 0x1f4   :  { %v508_v63 = vadd.f32 %v506_v62, %v498_v61 }
 0x1f6   :  { %2985 = vtanh.f32 %v508_v63 }
 0x1fc   :  { %v2984_v0 = vpop.eup %2983 }
 0x1fd   :  { %535 = vrot.lane.b32.xlu0 %v2984_v0, %s3118_s2 }
 0x200   :  { %v2986_v2 = vpop.eup %2985 }
 0x201   :  { %511 = vrot.lane.b32.xlu1 %v2986_v2, %s3118_s2 }
 0x26f   :  { %v536_v4 = vpop.permute.xlu0 %535 }
 0x270   :  { %v3370_v6 = vmul.f32 %v2980_v38, %v536_v4 }
 0x272   :  { %625 = vrot.lane.b32.xlu0 %v3370_v6, %s3119_s20 }
 0x273   :  { %v512_v7 = vpop.permute.xlu1 %511 }
 0x274   :  { %v514_v8 = vmul.f32 %v2982_v53, %v512_v7 }
 0x276   :  { %540 = vrot.lane.b32.xlu1 %v514_v8, %s3119_s20 }
 0x2e4   :  { %v626_v9 = vpop.permute.xlu0 %625 }
 0x2e5   :  { %2644 = vmatmul.mubr.msk.f32.vlgmr.msra.gmra.mrb[12].mxu1 %vm313_vm2, %v626_v9 }
 0x2e6   :  { %2846 = vmatpush3.bf16.msra.mxu1 %v3273_v27  ;;  %2665 = vmatprep.mubr.msk.f32.mxu1 %vm3117_vm1, %v3115_v3 }
 0x2e7   :  { %2847 = vmatprep.subr.bf16.mxu1 %v3116_v15 }
 0x2e8   :  { %v541_v11 = vpop.permute.xlu1 %540 }
 0x2e9   :  { %543 = vst.msk [vmem:[#allocation3] sm:$0xff] %vm313_vm2, %v541_v11  ;;  %2633 = vmatmul.mubr.msk.f32.vlgmr.msra.gmra.mrb[16].mxu0 %vm313_vm2, %v541_v11 }
 0x2ea   :  { %2840 = vmatpush3.bf16.msra.mxu0 %v3212_v14  ;;  %2849 = vmatpush3.bf16.msra.mxu1 %v3285_v30 }
 0x2eb   :  { %2841 = vmatprep.subr.bf16.mxu0 %v3116_v15  ;;  %2654 = vmatprep.mubr.msk.f32.mxu0 %vm3117_vm1, %v3115_v3 }
 0x2ec   :  { %2856 = vmatprep.subr.bf16.mxu1 %v3116_v15 }
 0x2ee   :  { %2843 = vmatpush3.bf16.msra.mxu0 %v3233_v20 }
 0x2ef   :  { %2850 = vmatprep.subr.bf16.mxu0 %v3116_v15 }
 0x3b8   :  { %v695_v12 = vpop.f32.mrb[12].mxu1 }
 0x3b9   :  { %v699_v13 = vadd.f32 %v695_v12, %v3359_v28  ;;  %v2645_v17 = vpop.f32.mrb[13].mxu1 }
 0x3bb   :  { %2987 = vtanh.f32 %v699_v13  ;;  %v2410_v29 = vmul.f32 -1.442695, %v699_v13 }
 0x3bc   :  { %v619_v18 = vpop.f32.mrb[16].mxu0 }
 0x3bd   :  { %v623_v21 = vadd.f32 %v619_v18, %v3324_v49  ;;  %v2634_v23 = vpop.f32.mrb[17].mxu0 }
 0x3bf   :  { %2989 = vtanh.f32 %v623_v21  ;;  %v2409_v31 = vmul.f32 -1.442695, %v623_v21 }
 0x3c0   :  { %2991 = vpow2.f32 %v2410_v29 }
 0x3c1   :  { %2993 = vpow2.f32 %v2409_v31 }
 0x3c5   :  { %v2988_v25 = vpop.eup %2987 }
 0x3c6   :  { %733 = vrot.lane.b32.xlu0 %v2988_v25, %s3118_s2 }
 0x3c9   :  { %v2990_v26 = vpop.eup %2989 }
 0x3ca   :  { %709 = vrot.lane.b32.xlu1 %v2990_v26, %s3118_s2  ;;  %v2992_v36 = vpop.eup %2991 }
 0x3cb   :  { %v727_v39 = vadd.f32 1.0, %v2992_v36  ;;  %v2994_v28 = vpop.eup %2993 }
 0x3cc   :  { %v703_v40 = vadd.f32 1.0, %v2994_v28 }
 0x3cd   :  { %2995 = vrcp.f32 %v727_v39 }
 0x3ce   :  { %2997 = vrcp.f32 %v703_v40 }
 0x3d7   :  { %v2996_v41 = vpop.eup %2995 }
 0x3d8   :  { %v2998_v43 = vpop.eup %2997  ;;  %v731_v37 = vmul.f32 %v2996_v41, %v532_v59 }
 0x3d9   :  { %v707_v38 = vmul.f32 %v2998_v43, %v508_v63 }
 0x438   :  { %v734_v49 = vpop.permute.xlu0 %733 }
 0x439   :  { %v736_v42 = vmul.f32 %v2996_v41, %v734_v49 }
 0x43b   :  { %738 = vrot.lane.b32.xlu0 %v736_v42, %s3119_s20 }
 0x43c   :  { %v710_v45 = vpop.permute.xlu1 %709 }
 0x43d   :  { %v712_v46 = vmul.f32 %v2998_v43, %v710_v45 }
 0x43f   :  { %714 = vrot.lane.b32.xlu1 %v712_v46, %s3119_s20 }
 0x4ad   :  { %v739_v47 = vpop.permute.xlu0 %738 }
 0x4ae   :  { %v741_v48 = vadd.f32 %v739_v47, %v731_v37 }
 0x4b0   :  { %2999 = vtanh.f32 %v741_v48 }
 0x4b1   :  { %v715_v50 = vpop.permute.xlu1 %714 }
 0x4b2   :  { %v717_v51 = vadd.f32 %v715_v50, %v707_v38 }
 0x4b4   :  { %3001 = vtanh.f32 %v717_v51 }
 0x4ba   :  { %v3000_v53 = vpop.eup %2999 }
 0x4bb   :  { %744 = vrot.lane.b32.xlu0 %v3000_v53, %s3118_s2 }
 0x4be   :  { %v3002_v54 = vpop.eup %3001 }
 0x4bf   :  { %720 = vrot.lane.b32.xlu1 %v3002_v54, %s3118_s2 }
 0x52d   :  { %v745_v55 = vpop.permute.xlu0 %744 }
 0x52e   :  { %v3398_v56 = vmul.f32 %v2996_v41, %v745_v55 }
 0x530   :  { %833 = vrot.lane.b32.xlu0 %v3398_v56, %s3119_s20 }
 0x531   :  { %v721_v58 = vpop.permute.xlu1 %720 }
 0x532   :  { %v723_v59 = vmul.f32 %v2998_v43, %v721_v58 }
 0x534   :  { %749 = vrot.lane.b32.xlu1 %v723_v59, %s3119_s20 }
 0x5a2   :  { %v834_v61 = vpop.permute.xlu0 %833 }
 0x5a3   :  { %2666 = vmatmul.mubr.msk.f32.vlgmr.msra.gmra.mrb[14].mxu1 %vm313_vm2, %v834_v61 }
 0x5a4   :  { %2858 = vmatpush3.bf16.msra.mxu1 %v3273_v27  ;;  %2687 = vmatprep.mubr.msk.f32.mxu1 %vm3117_vm1, %v3115_v3 }
 0x5a5   :  { %2859 = vmatprep.subr.bf16.mxu1 %v3116_v15 }
 0x5a6   :  { %v750_v62 = vpop.permute.xlu1 %749 }
 0x5a7   :  { %752 = vst.msk [vmem:[#allocation3 + $0x8] sm:$0xff] %vm313_vm2, %v750_v62  ;;  %2655 = vmatmul.mubr.msk.f32.vlgmr.msra.gmra.mrb[18].mxu0 %vm313_vm2, %v750_v62 }
 0x5a8   :  { %2852 = vmatpush3.bf16.msra.mxu0 %v3212_v14  ;;  %2861 = vmatpush3.bf16.msra.mxu1 %v3285_v30 }
 0x5a9   :  { %2853 = vmatprep.subr.bf16.mxu0 %v3116_v15  ;;  %2676 = vmatprep.mubr.msk.f32.mxu0 %vm3117_vm1, %v3115_v3 }
 0x5aa   :  { %2868 = vmatprep.subr.bf16.mxu1 %v3116_v15 }
 0x5ac   :  { %2855 = vmatpush3.bf16.msra.mxu0 %v3233_v20 }
 0x5ad   :  { %2862 = vmatprep.subr.bf16.mxu0 %v3116_v15 }
 0x676   :  { %v903_v63 = vpop.f32.mrb[14].mxu1 }
 0x677   :  { %v907_v0 = vadd.f32 %v903_v63, %v3354_v22  ;;  %v2667_v2 = vpop.f32.mrb[15].mxu1 }
 0x679   :  { %3003 = vtanh.f32 %v907_v0  ;;  %v2414_v12 = vmul.f32 -1.442695, %v907_v0 }
 0x67a   :  { %v827_v4 = vpop.f32.mrb[18].mxu0 }
 0x67b   :  { %v831_v7 = vadd.f32 %v827_v4, %v3331_v57  ;;  %v2656_v8 = vpop.f32.mrb[19].mxu0 }
 0x67d   :  { %3005 = vtanh.f32 %v831_v7  ;;  %v2413_v13 = vmul.f32 -1.442695, %v831_v7 }
 0x67e   :  { %3007 = vpow2.f32 %v2414_v12 }
 0x67f   :  { %3009 = vpow2.f32 %v2413_v13 }
 0x683   :  { %v3004_v9 = vpop.eup %3003 }
 0x684   :  { %941 = vrot.lane.b32.xlu0 %v3004_v9, %s3118_s2 }
 0x687   :  { %v3006_v11 = vpop.eup %3005 }
 0x688   :  { %917 = vrot.lane.b32.xlu1 %v3006_v11, %s3118_s2  ;;  %v3008_v17 = vpop.eup %3007 }
 0x689   :  { %v935_v18 = vadd.f32 1.0, %v3008_v17  ;;  %v3010_v22 = vpop.eup %3009 }
 0x68a   :  { %v911_v21 = vadd.f32 1.0, %v3010_v22 }
 0x68b   :  { %3011 = vrcp.f32 %v935_v18 }
 0x68c   :  { %3013 = vrcp.f32 %v911_v21 }
 0x695   :  { %v3012_v23 = vpop.eup %3011 }
 0x696   :  { %v3014_v26 = vpop.eup %3013  ;;  %v939_v36 = vmul.f32 %v3012_v23, %v741_v48 }
 0x697   :  { %v915_v40 = vmul.f32 %v3014_v26, %v717_v51 }
 0x6f6   :  { %v942_v57 = vpop.permute.xlu0 %941 }
 0x6f7   :  { %v944_v25 = vmul.f32 %v3012_v23, %v942_v57 }
 0x6f9   :  { %946 = vrot.lane.b32.xlu0 %v944_v25, %s3119_s20 }
 0x6fa   :  { %v918_v29 = vpop.permute.xlu1 %917 }
 0x6fb   :  { %v920_v31 = vmul.f32 %v3014_v26, %v918_v29 }
 0x6fd   :  { %922 = vrot.lane.b32.xlu1 %v920_v31, %s3119_s20 }
 0x76b   :  { %v947_v39 = vpop.permute.xlu0 %946 }
 0x76c   :  { %v949_v28 = vadd.f32 %v947_v39, %v939_v36 }
 0x76e   :  { %3015 = vtanh.f32 %v949_v28 }
 0x76f   :  { %v923_v41 = vpop.permute.xlu1 %922 }
 0x770   :  { %v925_v49 = vadd.f32 %v923_v41, %v915_v40 }
 0x772   :  { %3017 = vtanh.f32 %v925_v49 }
 0x778   :  { %v3016_v42 = vpop.eup %3015 }
 0x779   :  { %952 = vrot.lane.b32.xlu0 %v3016_v42, %s3118_s2 }
 0x77c   :  { %v3018_v43 = vpop.eup %3017 }
 0x77d   :  { %928 = vrot.lane.b32.xlu1 %v3018_v43, %s3118_s2 }
 0x7eb   :  { %v953_v45 = vpop.permute.xlu0 %952 }
 0x7ec   :  { %v3426_v46 = vmul.f32 %v3012_v23, %v953_v45 }
 0x7ee   :  { %1041 = vrot.lane.b32.xlu0 %v3426_v46, %s3119_s20 }
 0x7ef   :  { %v929_v37 = vpop.permute.xlu1 %928 }
 0x7f0   :  { %v931_v47 = vmul.f32 %v3014_v26, %v929_v37 }
 0x7f2   :  { %957 = vrot.lane.b32.xlu1 %v931_v47, %s3119_s20 }
 0x860   :  { %v1042_v48 = vpop.permute.xlu0 %1041 }
 0x861   :  { %2688 = vmatmul.mubr.msk.f32.vlgmr.msra.gmra.mrb[16].mxu1 %vm313_vm2, %v1042_v48 }
 0x862   :  { %2870 = vmatpush3.bf16.msra.mxu1 %v3273_v27  ;;  %2709 = vmatprep.mubr.msk.f32.mxu1 %vm3117_vm1, %v3115_v3 }
 0x863   :  { %2871 = vmatprep.subr.bf16.mxu1 %v3116_v15 }
 0x864   :  { %v958_v38 = vpop.permute.xlu1 %957 }
 0x865   :  { %960 = vst.msk [vmem:[#allocation3 + $0x10] sm:$0xff] %vm313_vm2, %v958_v38  ;;  %2677 = vmatmul.mubr.msk.f32.vlgmr.msra.gmra.mrb[20].mxu0 %vm313_vm2, %v958_v38 }
 0x866   :  { %2864 = vmatpush3.bf16.msra.mxu0 %v3212_v14  ;;  %2873 = vmatpush3.bf16.msra.mxu1 %v3285_v30 }
 0x867   :  { %2865 = vmatprep.subr.bf16.mxu0 %v3116_v15  ;;  %2698 = vmatprep.mubr.msk.f32.mxu0 %vm3117_vm1, %v3115_v3 }
 0x868   :  { %2880 = vmatprep.subr.bf16.mxu1 %v3116_v15 }
 0x86a   :  { %2867 = vmatpush3.bf16.msra.mxu0 %v3233_v20 }
 0x86b   :  { %2874 = vmatprep.subr.bf16.mxu0 %v3116_v15 }
 0x934   :  { %v1111_v50 = vpop.f32.mrb[16].mxu1 }
 0x935   :  { %v1115_v51 = vadd.f32 %v1111_v50, %v3349_v16  ;;  %v2689_v53 = vpop.f32.mrb[17].mxu1 }
 0x937   :  { %3019 = vtanh.f32 %v1115_v51  ;;  %v2418_v62 = vmul.f32 -1.442695, %v1115_v51 }
 0x938   :  { %v1035_v54 = vpop.f32.mrb[20].mxu0 }
 0x939   :  { %v1039_v55 = vadd.f32 %v1035_v54, %v3338_v1  ;;  %v2678_v58 = vpop.f32.mrb[21].mxu0 }
 0x93b   :  { %3021 = vtanh.f32 %v1039_v55  ;;  %v2417_v63 = vmul.f32 -1.442695, %v1039_v55 }
 0x93c   :  { %3023 = vpow2.f32 %v2418_v62 }
 0x93d   :  { %3025 = vpow2.f32 %v2417_v63 }
 0x941   :  { %v3020_v59 = vpop.eup %3019 }
 0x942   :  { %1149 = vrot.lane.b32.xlu0 %v3020_v59, %s3118_s2 }
 0x945   :  { %v3022_v61 = vpop.eup %3021 }
 0x946   :  { %1125 = vrot.lane.b32.xlu1 %v3022_v61, %s3118_s2  ;;  %v3024_v0 = vpop.eup %3023 }
 0x947   :  { %v1143_v2 = vadd.f32 1.0, %v3024_v0  ;;  %v3026_v16 = vpop.eup %3025 }
 0x948   :  { %v1119_v4 = vadd.f32 1.0, %v3026_v16 }
 0x949   :  { %3027 = vrcp.f32 %v1143_v2 }
 0x94a   :  { %3029 = vrcp.f32 %v1119_v4 }
 0x953   :  { %v3028_v7 = vpop.eup %3027 }
 0x954   :  { %v3030_v9 = vpop.eup %3029  ;;  %v1147_v13 = vmul.f32 %v3028_v7, %v949_v28 }
 0x955   :  { %v1123_v22 = vmul.f32 %v3030_v9, %v925_v49 }
 0x9b4   :  { %v1150_v1 = vpop.permute.xlu0 %1149 }
 0x9b5   :  { %v1152_v8 = vmul.f32 %v3028_v7, %v1150_v1 }
 0x9b7   :  { %1154 = vrot.lane.b32.xlu0 %v1152_v8, %s3119_s20 }
 0x9b8   :  { %v1126_v11 = vpop.permute.xlu1 %1125 }
 0x9b9   :  { %v1128_v12 = vmul.f32 %v3030_v9, %v1126_v11 }
 0x9bb   :  { %1130 = vrot.lane.b32.xlu1 %v1128_v12, %s3119_s20 }
 0xa29   :  { %v1155_v17 = vpop.permute.xlu0 %1154 }
 0xa2a   :  { %v1157_v18 = vadd.f32 %v1155_v17, %v1147_v13 }
 0xa2c   :  { %3031 = vtanh.f32 %v1157_v18 }
 0xa2d   :  { %v1131_v21 = vpop.permute.xlu1 %1130 }
 0xa2e   :  { %v1133_v23 = vadd.f32 %v1131_v21, %v1123_v22 }
 0xa30   :  { %3033 = vtanh.f32 %v1133_v23 }
 0xa36   :  { %v3032_v57 = vpop.eup %3031 }
 0xa37   :  { %1160 = vrot.lane.b32.xlu0 %v3032_v57, %s3118_s2 }
 0xa3a   :  { %v3034_v25 = vpop.eup %3033 }
 0xa3b   :  { %1136 = vrot.lane.b32.xlu1 %v3034_v25, %s3118_s2 }
 0xaa9   :  { %v1161_v26 = vpop.permute.xlu0 %1160 }
 0xaaa   :  { %v3454_v29 = vmul.f32 %v3028_v7, %v1161_v26 }
 0xaac   :  { %1249 = vrot.lane.b32.xlu0 %v3454_v29, %s3119_s20 }
 0xaad   :  { %v1137_v31 = vpop.permute.xlu1 %1136 }
 0xaae   :  { %v1139_v36 = vmul.f32 %v3030_v9, %v1137_v31 }
 0xab0   :  { %1165 = vrot.lane.b32.xlu1 %v1139_v36, %s3119_s20 }
 0xb1e   :  { %v1250_v39 = vpop.permute.xlu0 %1249 }
 0xb1f   :  { %2710 = vmatmul.mubr.msk.f32.vlgmr.msra.gmra.mrb[18].mxu1 %vm313_vm2, %v1250_v39 }
 0xb20   :  { %2882 = vmatpush3.bf16.msra.mxu1 %v3273_v27  ;;  %2731 = vmatprep.mubr.msk.f32.mxu1 %vm3117_vm1, %v3115_v3 }
 0xb21   :  { %2883 = vmatprep.subr.bf16.mxu1 %v3116_v15 }
 0xb22   :  { %v1166_v28 = vpop.permute.xlu1 %1165 }
 0xb23   :  { %1168 = vst.msk [vmem:[#allocation3 + $0x18] sm:$0xff] %vm313_vm2, %v1166_v28  ;;  %2699 = vmatmul.mubr.msk.f32.vlgmr.msra.gmra.mrb[22].mxu0 %vm313_vm2, %v1166_v28 }
 0xb24   :  { %2876 = vmatpush3.bf16.msra.mxu0 %v3212_v14  ;;  %2885 = vmatpush3.bf16.msra.mxu1 %v3285_v30 }
 0xb25   :  { %2877 = vmatprep.subr.bf16.mxu0 %v3116_v15  ;;  %2720 = vmatprep.mubr.msk.f32.mxu0 %vm3117_vm1, %v3115_v3 }
 0xb26   :  { %2892 = vmatprep.subr.bf16.mxu1 %v3116_v15 }
 0xb28   :  { %2879 = vmatpush3.bf16.msra.mxu0 %v3233_v20 }
 0xb29   :  { %2886 = vmatprep.subr.bf16.mxu0 %v3116_v15 }
 0xbf2   :  { %v1319_v40 = vpop.f32.mrb[18].mxu1 }
 0xbf3   :  { %v1323_v41 = vadd.f32 %v1319_v40, %v3342_v5  ;;  %v2711_v49 = vpop.f32.mrb[19].mxu1 }
 0xbf5   :  { %3035 = vtanh.f32 %v1323_v41  ;;  %v2422_v48 = vmul.f32 -1.442695, %v1323_v41 }
 0xbf6   :  { %v1243_v42 = vpop.f32.mrb[22].mxu0 }
 0xbf7   :  { %v1247_v43 = vadd.f32 %v1243_v42, %v3346_v10  ;;  %v2700_v45 = vpop.f32.mrb[23].mxu0 }
 0xbf9   :  { %3037 = vtanh.f32 %v1247_v43  ;;  %v2421_v38 = vmul.f32 -1.442695, %v1247_v43 }
 0xbfa   :  { %3039 = vpow2.f32 %v2422_v48 }
 0xbfb   :  { %3041 = vpow2.f32 %v2421_v38 }
 0xbff   :  { %v3036_v37 = vpop.eup %3035 }
 0xc00   :  { %1357 = vrot.lane.b32.xlu0 %v3036_v37, %s3118_s2 }
 0xc03   :  { %v3038_v47 = vpop.eup %3037 }
 0xc04   :  { %1333 = vrot.lane.b32.xlu1 %v3038_v47, %s3118_s2  ;;  %v3040_v50 = vpop.eup %3039 }
 0xc05   :  { %v1351_v51 = vadd.f32 1.0, %v3040_v50  ;;  %v3042_v5 = vpop.eup %3041 }
 0xc06   :  { %v1327_v53 = vadd.f32 1.0, %v3042_v5 }
 0xc07   :  { %3043 = vrcp.f32 %v1351_v51 }
 0xc08   :  { %3045 = vrcp.f32 %v1327_v53 }
 0xc11   :  { %v3044_v54 = vpop.eup %3043 }
 0xc12   :  { %v3046_v58 = vpop.eup %3045  ;;  %v1355_v62 = vmul.f32 %v3044_v54, %v1157_v18 }
 0xc13   :  { %v1331_v2 = vmul.f32 %v3046_v58, %v1133_v23 }
 0xc72   :  { %v1358_v10 = vpop.permute.xlu0 %1357 }
 0xc73   :  { %v1360_v55 = vmul.f32 %v3044_v54, %v1358_v10 }
 0xc75   :  { %1362 = vrot.lane.b32.xlu0 %v1360_v55, %s3119_s20 }
 0xc76   :  { %v1334_v59 = vpop.permute.xlu1 %1333 }
 0xc77   :  { %v1336_v61 = vmul.f32 %v3046_v58, %v1334_v59 }
 0xc79   :  { %1338 = vrot.lane.b32.xlu1 %v1336_v61, %s3119_s20 }
 0xce7   :  { %v1363_v63 = vpop.permute.xlu0 %1362 }
 0xce8   :  { %v1365_v0 = vadd.f32 %v1363_v63, %v1355_v62 }
 0xcea   :  { %3047 = vtanh.f32 %v1365_v0 }
 0xceb   :  { %v1339_v16 = vpop.permute.xlu1 %1338 }
 0xcec   :  { %v1341_v4 = vadd.f32 %v1339_v16, %v1331_v2 }
 0xcee   :  { %3049 = vtanh.f32 %v1341_v4 }
 0xcf4   :  { %v3048_v7 = vpop.eup %3047 }
 0xcf5   :  { %1368 = vrot.lane.b32.xlu0 %v3048_v7, %s3118_s2 }
 0xcf8   :  { %v3050_v1 = vpop.eup %3049 }
 0xcf9   :  { %1344 = vrot.lane.b32.xlu1 %v3050_v1, %s3118_s2 }
 0xd67   :  { %v1369_v8 = vpop.permute.xlu0 %1368 }
 0xd68   :  { %v3482_v9 = vmul.f32 %v3044_v54, %v1369_v8 }
 0xd6a   :  { %1457 = vrot.lane.b32.xlu0 %v3482_v9, %s3119_s20 }
 0xd6b   :  { %v1345_v11 = vpop.permute.xlu1 %1344 }
 0xd6c   :  { %v1347_v12 = vmul.f32 %v3046_v58, %v1345_v11 }
 0xd6e   :  { %1373 = vrot.lane.b32.xlu1 %v1347_v12, %s3119_s20 }
 0xddc   :  { %v1458_v13 = vpop.permute.xlu0 %1457 }
 0xddd   :  { %2732 = vmatmul.mubr.msk.f32.vlgmr.msra.gmra.mrb[20].mxu1 %vm313_vm2, %v1458_v13 }
 0xdde   :  { %2894 = vmatpush3.bf16.msra.mxu1 %v3273_v27  ;;  %2753 = vmatprep.mubr.msk.f32.mxu1 %vm3117_vm1, %v3115_v3 }
 0xddf   :  { %2895 = vmatprep.subr.bf16.mxu1 %v3116_v15 }
 0xde0   :  { %v3492_v17 = vpop.permute.xlu1 %1373 }
 0xde1   :  { %2721 = vmatmul.mubr.msk.f32.vlgmr.msra.gmra.mrb[24].mxu0 %vm313_vm2, %v3492_v17 }
 0xde2   :  { %2888 = vmatpush3.bf16.msra.mxu0 %v3212_v14  ;;  %2897 = vmatpush3.bf16.msra.mxu1 %v3285_v30 }
 0xde3   :  { %2889 = vmatprep.subr.bf16.mxu0 %v3116_v15  ;;  %2742 = vmatprep.mubr.msk.f32.mxu0 %vm3117_vm1, %v3115_v3 }
 0xde4   :  { %2904 = vmatprep.subr.bf16.mxu1 %v3116_v15 }
 0xde6   :  { %2891 = vmatpush3.bf16.msra.mxu0 %v3233_v20 }
 0xde7   :  { %2898 = vmatprep.subr.bf16.mxu0 %v3116_v15 }
 0xeb0   :  { %v1527_v18 = vpop.f32.mrb[20].mxu1 }
 0xeb1   :  { %v1531_v22 = vadd.f32 %v1527_v18, %v3335_v60  ;;  %v2733_v21 = vpop.f32.mrb[21].mxu1 }
 0xeb3   :  { %3051 = vtanh.f32 %v1531_v22  ;;  %v2426_v36 = vmul.f32 -1.442695, %v1531_v22 }
 0xeb4   :  { %v1451_v23 = vpop.f32.mrb[24].mxu0 }
 0xeb5   :  { %v1455_v57 = vadd.f32 %v1451_v23, %v3351_v19  ;;  %v2722_v25 = vpop.f32.mrb[25].mxu0 }
 0xeb7   :  { %3053 = vtanh.f32 %v1455_v57  ;;  %v2425_v39 = vmul.f32 -1.442695, %v1455_v57 }
 0xeb8   :  { %3055 = vpow2.f32 %v2426_v36 }
 0xeb9   :  { %3057 = vpow2.f32 %v2425_v39 }
 0xebd   :  { %v3052_v26 = vpop.eup %3051 }
 0xebe   :  { %1565 = vrot.lane.b32.xlu0 %v3052_v26, %s3118_s2 }
 0xec1   :  { %v3054_v31 = vpop.eup %3053 }
 0xec2   :  { %1541 = vrot.lane.b32.xlu1 %v3054_v31, %s3118_s2  ;;  %v3056_v28 = vpop.eup %3055 }
 0xec3   :  { %v1559_v40 = vadd.f32 1.0, %v3056_v28  ;;  %v3058_v60 = vpop.eup %3057 }
 0xec4   :  { %v1535_v41 = vadd.f32 1.0, %v3058_v60 }
 0xec5   :  { %3059 = vrcp.f32 %v1559_v40 }
 0xec6   :  { %3061 = vrcp.f32 %v1535_v41 }
 0xecf   :  { %v3060_v49 = vpop.eup %3059 }
 0xed0   :  { %v3062_v43 = vpop.eup %3061  ;;  %v1563_v47 = vmul.f32 %v3060_v49, %v1365_v0 }
 0xed1   :  { %v1539_v50 = vmul.f32 %v3062_v43, %v1341_v4 }
 0xf30   :  { %v1566_v19 = vpop.permute.xlu0 %1565 }
 0xf31   :  { %v1568_v42 = vmul.f32 %v3060_v49, %v1566_v19 }
 0xf33   :  { %1570 = vrot.lane.b32.xlu0 %v1568_v42, %s3119_s20 }
 0xf34   :  { %v1542_v45 = vpop.permute.xlu1 %1541 }
 0xf35   :  { %v1544_v37 = vmul.f32 %v3062_v43, %v1542_v45 }
 0xf37   :  { %1546 = vrot.lane.b32.xlu1 %v1544_v37, %s3119_s20 }
 0xfa5   :  { %v1571_v48 = vpop.permute.xlu0 %1570 }
 0xfa6   :  { %v1573_v38 = vadd.f32 %v1571_v48, %v1563_v47 }
 0xfa8   :  { %3063 = vtanh.f32 %v1573_v38 }
 0xfa9   :  { %v1547_v51 = vpop.permute.xlu1 %1546 }
 0xfaa   :  { %v1549_v5 = vadd.f32 %v1547_v51, %v1539_v50 }
 0xfac   :  { %3065 = vtanh.f32 %v1549_v5 }
 0xfb2   :  { %v3064_v53 = vpop.eup %3063 }
 0xfb3   :  { %1576 = vrot.lane.b32.xlu0 %v3064_v53, %s3118_s2 }
 0xfb6   :  { %v3066_v54 = vpop.eup %3065 }
 0xfb7   :  { %1552 = vrot.lane.b32.xlu1 %v3066_v54, %s3118_s2 }
0x1025   :  { %v1577_v10 = vpop.permute.xlu0 %1576 }
0x1026   :  { %v3512_v55 = vmul.f32 %v3060_v49, %v1577_v10 }
0x1028   :  { %1665 = vrot.lane.b32.xlu0 %v3512_v55, %s3119_s20 }
0x1029   :  { %v1553_v58 = vpop.permute.xlu1 %1552 }
0x102a   :  { %v1555_v59 = vmul.f32 %v3062_v43, %v1553_v58 }
0x102c   :  { %1581 = vrot.lane.b32.xlu1 %v1555_v59, %s3119_s20 }
0x109a   :  { %v1666_v61 = vpop.permute.xlu0 %1665 }
0x109b   :  { %2754 = vmatmul.mubr.msk.f32.vlgmr.msra.gmra.mrb[22].mxu1 %vm313_vm2, %v1666_v61 }
0x109c   :  { %2906 = vmatpush3.bf16.msra.mxu1 %v3273_v27  ;;  %2775 = vmatprep.mubr.msk.f32.mxu1 %vm3117_vm1, %v3115_v3 }
0x109d   :  { %2907 = vmatprep.subr.bf16.mxu1 %v3116_v15 }
0x109e   :  { %v3522_v62 = vpop.permute.xlu1 %1581 }
0x109f   :  { %2743 = vmatmul.mubr.msk.f32.vlgmr.msra.gmra.mrb[26].mxu0 %vm313_vm2, %v3522_v62 }
0x10a0   :  { %2900 = vmatpush3.bf16.msra.mxu0 %v3212_v14  ;;  %2909 = vmatpush3.bf16.msra.mxu1 %v3285_v30 }
0x10a1   :  { %2901 = vmatprep.subr.bf16.mxu0 %v3116_v15  ;;  %2764 = vmatprep.mubr.msk.f32.mxu0 %vm3117_vm1, %v3115_v3 }
0x10a4   :  { %2903 = vmatpush3.bf16.msra.mxu0 %v3233_v20 }
0x116e   :  { %v1735_v27 = vpop.f32.mrb[22].mxu1 }
0x116f   :  { %v1739_v63 = vadd.f32 %v1735_v27, %v3328_v52  ;;  %v2755_v0 = vpop.f32.mrb[23].mxu1 }
0x1171   :  { %3067 = vtanh.f32 %v1739_v63  ;;  %v2430_v15 = vmul.f32 -1.442695, %v1739_v63 }
0x1172   :  { %v1659_v2 = vpop.f32.mrb[26].mxu0 }
0x1173   :  { %v1663_v16 = vadd.f32 %v1659_v2, %v3356_v24  ;;  %v2744_v4 = vpop.f32.mrb[27].mxu0 }
0x1175   :  { %3069 = vtanh.f32 %v1663_v16  ;;  %v2429_v7 = vmul.f32 -1.442695, %v1663_v16 }
0x1176   :  { %3071 = vpow2.f32 %v2430_v15 }
0x1177   :  { %3073 = vpow2.f32 %v2429_v7 }
0x117b   :  { %v3068_v14 = vpop.eup %3067 }
0x117c   :  { %1773 = vrot.lane.b32.xlu0 %v3068_v14, %s3118_s2 }
0x117f   :  { %v3070_v30 = vpop.eup %3069 }
0x1180   :  { %1749 = vrot.lane.b32.xlu1 %v3070_v30, %s3118_s2  ;;  %v3072_v20 = vpop.eup %3071 }
0x1181   :  { %v1767_v1 = vadd.f32 1.0, %v3072_v20  ;;  %v3074_v52 = vpop.eup %3073  ;;  %v2014_v20 = vld [vmem:[%s3763_s5] sm:$0xff] }
0x1182   :  { %v1743_v8 = vadd.f32 1.0, %v3074_v52  ;;  %v2016_v52 = vld [vmem:[%s3763_s5 + $0x10] sm:$0xff] }
0x1183   :  { %3075 = vrcp.f32 %v1767_v1  ;;  %v2015_v1 = vld [vmem:[%s3763_s5 + $0x8] sm:$0xff] }
0x1184   :  { %3077 = vrcp.f32 %v1743_v8  ;;  %v2910_v8 = vpack.c.bf16 %v2015_v1, %v2014_v20  ;;  %v2274_v20 = vld [vmem:[%s3765_s8 + $0x28] sm:$0xff]  ;;  %v2291_v1 = vld [vmem:[%s3765_s8 + $0xb0] sm:$0xff] }
0x1186   :  { %2911 = vmatprep.subr.bf16.mxu0 %v2910_v8 }
0x118d   :  { %v3076_v11 = vpop.eup %3075 }
0x118e   :  { %v3078_v13 = vpop.eup %3077  ;;  %v1771_v21 = vmul.f32 %v3076_v11, %v1573_v38 }
0x118f   :  { %v1747_v25 = vmul.f32 %v3078_v13, %v1549_v5 }
0x11ee   :  { %v1774_v24 = vpop.permute.xlu0 %1773 }
0x11ef   :  { %v1776_v12 = vmul.f32 %v3076_v11, %v1774_v24 }
0x11f1   :  { %1778 = vrot.lane.b32.xlu0 %v1776_v12, %s3119_s20  ;;  %v2018_v12 = vld [vmem:[%s3763_s5 + $0x20] sm:$0xff] }
0x11f2   :  { %v1750_v18 = vpop.permute.xlu1 %1749 }
0x11f3   :  { %v1752_v22 = vmul.f32 %v3078_v13, %v1750_v18 }
0x11f5   :  { %1754 = vrot.lane.b32.xlu1 %v1752_v22, %s3119_s20 }
0x1263   :  { %v1779_v23 = vpop.permute.xlu0 %1778 }
0x1264   :  { %v1781_v57 = vadd.f32 %v1779_v23, %v1771_v21 }
0x1266   :  { %3079 = vtanh.f32 %v1781_v57 }
0x1267   :  { %v1755_v26 = vpop.permute.xlu1 %1754 }
0x1268   :  { %v1757_v31 = vadd.f32 %v1755_v26, %v1747_v25 }
0x126a   :  { %3081 = vtanh.f32 %v1757_v31 }
0x1270   :  { %v3080_v36 = vpop.eup %3079 }
0x1271   :  { %1784 = vrot.lane.b32.xlu0 %v3080_v36, %s3118_s2 }
0x1274   :  { %v3082_v39 = vpop.eup %3081 }
0x1275   :  { %1760 = vrot.lane.b32.xlu1 %v3082_v39, %s3118_s2 }
0x12e3   :  { %v1785_v28 = vpop.permute.xlu0 %1784 }
0x12e4   :  { %v1787_v40 = vmul.f32 %v3076_v11, %v1785_v28  ;;  %v2017_v11 = vld [vmem:[%s3763_s5 + $0x18] sm:$0xff] }
0x12e5   :  { %v2914_v24 = vpack.c.bf16 %v2017_v11, %v2016_v52  ;;  %v2292_v52 = vld [vmem:[%s3765_s8 + $0xb8] sm:$0xff] }
0x12e6   :  { %1873 = vrot.lane.b32.xlu0 %v1787_v40, %s3119_s20  ;;  %v2946_v11 = vpack.c.bf16 %v2292_v52, %v2291_v1 }
0x12e7   :  { %v1761_v60 = vpop.permute.xlu1 %1760 }
0x12e8   :  { %v1763_v41 = vmul.f32 %v3078_v13, %v1761_v60  ;;  %v2019_v13 = vld [vmem:[%s3763_s5 + $0x28] sm:$0xff] }
0x12e9   :  { %v2918_v18 = vpack.c.bf16 %v2019_v13, %v2018_v12  ;;  %v2276_v12 = vld [vmem:[%s3765_s8 + $0x38] sm:$0xff]  ;;  %v2293_v13 = vld [vmem:[%s3765_s8 + $0xc0] sm:$0xff] }
0x12ea   :  { %1789 = vrot.lane.b32.xlu1 %v1763_v41, %s3119_s20 }
0x1358   :  { %v1874_v49 = vpop.permute.xlu0 %1873 }
0x1359   :  { %2776 = vmatmul.mubr.msk.f32.vlgmr.msra.gmra.mrb[24].mxu1 %vm313_vm2, %v1874_v49 }
0x135c   :  { %v3543_v19 = vpop.permute.xlu1 %1789 }
0x135d   :  { %2765 = vmatmul.mubr.msk.f32.vlgmr.msra.gmra.mrb[28].mxu0 %vm313_vm2, %v3543_v19 }
0x135e   :  { %2913 = vmatpush3.bf16.msra.mxu0 %v2910_v8 }
0x135f   :  { %2915 = vmatprep.subr.bf16.mxu0 %v2914_v24 }
0x1362   :  { %2917 = vmatpush3.bf16.msra.mxu0 %v2914_v24  ;;  %v2275_v24 = vld [vmem:[%s3765_s8 + $0x30] sm:$0xff] }
0x1363   :  { %2919 = vmatprep.subr.bf16.mxu0 %v2918_v18 }
0x1366   :  { %2921 = vmatpush3.bf16.msra.mxu0 %v2918_v18  ;;  %v2294_v18 = vld [vmem:[%s3765_s8 + $0xc8] sm:$0xff] }
0x142c   :  { %v1943_v42 = vpop.f32.mrb[24].mxu1 }
0x142d   :  { %v1947_v43 = vadd.f32 %v1943_v42, %v3321_v44  ;;  %v2777_v45 = vpop.f32.mrb[25].mxu1 }
0x142e   :  { %v2178_v45 = vld [vmem:[%s3764_s6 + $0x18] sm:$0xff] }
0x142f   :  { %3083 = vtanh.f32 %v1947_v43  ;;  %v2434_v51 = vmul.f32 -1.442695, %v1947_v43 }
0x1430   :  { %v1867_v37 = vpop.f32.mrb[28].mxu0 }
0x1431   :  { %v1871_v47 = vadd.f32 %v1867_v37, %v3361_v34  ;;  %v2766_v48 = vpop.f32.mrb[29].mxu0 }
0x1432   :  { %v2177_v48 = vld [vmem:[%s3764_s6 + $0x10] sm:$0xff] }
0x1433   :  { %3085 = vtanh.f32 %v1871_v47  ;;  %v2433_v5 = vmul.f32 -1.442695, %v1871_v47  ;;  %v2175_v47 = vld [vmem:[%s3764_s6] sm:$0xff] }
0x1434   :  { %3087 = vpow2.f32 %v2434_v51 }
0x1435   :  { %3089 = vpow2.f32 %v2433_v5  ;;  %v2179_v5 = vld [vmem:[%s3764_s6 + $0x20] sm:$0xff] }
0x1439   :  { %v3084_v38 = vpop.eup %3083 }
0x143a   :  { %1981 = vrot.lane.b32.xlu0 %v3084_v38, %s3118_s2  ;;  %v2928_v38 = vpack.c.bf16 %v2177_v48, %v2175_v47 }
0x143d   :  { %v3086_v50 = vpop.eup %3085 }
0x143e   :  { %1957 = vrot.lane.b32.xlu1 %v3086_v50, %s3118_s2  ;;  %v3088_v53 = vpop.eup %3087  ;;  %v2182_v50 = vld [vmem:[%s3764_s6 + $0x38] sm:$0xff] }
0x143f   :  { %v1975_v54 = vadd.f32 1.0, %v3088_v53  ;;  %v3090_v44 = vpop.eup %3089  ;;  %v2181_v53 = vld [vmem:[%s3764_s6 + $0x30] sm:$0xff] }
0x1440   :  { %v1951_v10 = vadd.f32 1.0, %v3090_v44  ;;  %v2285_v44 = vld [vmem:[%s3765_s8 + $0x80] sm:$0xff] }
0x1441   :  { %3091 = vrcp.f32 %v1975_v54  ;;  %v2932_v54 = vpack.c.bf16 %v2181_v53, %v2179_v5 }
0x1442   :  { %3093 = vrcp.f32 %v1951_v10  ;;  %v2286_v10 = vld [vmem:[%s3765_s8 + $0x88] sm:$0xff] }
0x144b   :  { %v3092_v58 = vpop.eup %3091 }
0x144c   :  { %v3094_v61 = vpop.eup %3093  ;;  %v1979_v0 = vmul.f32 %v3092_v58, %v1781_v57 }
0x144d   :  { %v1955_v4 = vmul.f32 %v3094_v61, %v1757_v31 }
0x14ac   :  { %v1982_v34 = vpop.permute.xlu0 %1981 }
0x14ad   :  { %v1984_v59 = vmul.f32 %v3092_v58, %v1982_v34  ;;  %v2934_v34 = vpack.c.bf16 %v2286_v10, %v2285_v44 }
0x14af   :  { %1986 = vrot.lane.b32.xlu0 %v1984_v59, %s3119_s20  ;;  %v2270_v59 = vld [vmem:[%s3765_s8 + $0x8] sm:$0xff]  ;;  %2935 = vmatprep.subr.bf16.mxu1 %v2934_v34  ;;  %v2029_v34 = vld [vmem:[#allocation2 + $0xb8] sm:$0xff] }
0x14b0   :  { %v1958_v27 = vpop.permute.xlu1 %1957 }
0x14b1   :  { %v1960_v63 = vmul.f32 %v3094_v61, %v1958_v27  ;;  %v2288_v27 = vld [vmem:[%s3765_s8 + $0x98] sm:$0xff] }
0x14b3   :  { %1962 = vrot.lane.b32.xlu1 %v1960_v63, %s3119_s20 }
0x1521   :  { %v1987_v2 = vpop.permute.xlu0 %1986 }
0x1522   :  { %v1989_v16 = vadd.f32 %v1987_v2, %v1979_v0  ;;  %v2271_v2 = vld [vmem:[%s3765_s8 + $0x10] sm:$0xff] }
0x1524   :  { %3095 = vtanh.f32 %v1989_v16  ;;  %v2272_v16 = vld [vmem:[%s3765_s8 + $0x18] sm:$0xff] }
0x1525   :  { %v1963_v14 = vpop.permute.xlu1 %1962 }
0x1526   :  { %v1965_v30 = vadd.f32 %v1963_v14, %v1955_v4  ;;  %v2289_v4 = vld [vmem:[%s3765_s8 + $0xa0] sm:$0xff]  ;;  %v2290_v14 = vld [vmem:[%s3765_s8 + $0xa8] sm:$0xff] }
0x1528   :  { %3097 = vtanh.f32 %v1965_v30  ;;  %v2940_v30 = vpack.c.bf16 %v2272_v16, %v2271_v2 }
0x152e   :  { %v3096_v15 = vpop.eup %3095 }
0x152f   :  { %1992 = vrot.lane.b32.xlu0 %v3096_v15, %s3118_s2  ;;  %v2942_v15 = vpack.c.bf16 %v2290_v14, %v2289_v4 }
0x1532   :  { %v3098_v7 = vpop.eup %3097 }
0x1533   :  { %1968 = vrot.lane.b32.xlu1 %v3098_v7, %s3118_s2  ;;  %v2273_v7 = vld [vmem:[%s3765_s8 + $0x20] sm:$0xff] }
0x1534   :  { %v2944_v8 = vpack.c.bf16 %v2274_v20, %v2273_v7 }
0x1537   :  { %1794 = vrot.lane.b32.xlu1 %v1787_v40, %s3118_s2 }
0x153b   :  { %1378 = vrot.lane.b32.xlu1 %v3482_v9, %s3118_s2  ;;  %v2020_v9 = vld [vmem:[%s3763_s5 + $0x30] sm:$0xff] }
0x153f   :  { %962 = vrot.lane.b32.xlu1 %v3426_v46, %s3118_s2  ;;  %v2021_v46 = vld [vmem:[%s3763_s5 + $0x38] sm:$0xff] }
0x1543   :  { %545 = vrot.lane.b32.xlu1 %v3370_v6, %s3118_s2  ;;  %v2922_v6 = vpack.c.bf16 %v2021_v46, %v2020_v9  ;;  %v2948_v9 = vpack.c.bf16 %v2276_v12, %v2275_v24  ;;  %v2950_v46 = vpack.c.bf16 %v2294_v18, %v2293_v13  ;;  %v2300_v24 = vld [vmem:[%s3765_s8 + $0xf8] sm:$0xff]  ;;  %v2283_v13 = vld [vmem:[%s3765_s8 + $0x70] sm:$0xff] }
0x1544   :  { %v2284_v18 = vld [vmem:[%s3765_s8 + $0x78] sm:$0xff] }
0x1545   :  { %2923 = vmatprep.subr.bf16.mxu0 %v2922_v6 }
0x1546   :  { %2925 = vmatpush3.bf16.msra.mxu0 %v2922_v6  ;;  %v2277_v6 = vld [vmem:[%s3765_s8 + $0x40] sm:$0xff] }
0x15a1   :  { %v1993_v22 = vpop.permute.xlu0 %1992 }
0x15a2   :  { %v1995_v21 = vmul.f32 %v3092_v58, %v1993_v22  ;;  %v2269_v58 = vld [vmem:[%s3765_s8] sm:$0xff]  ;;  %v2278_v22 = vld [vmem:[%s3765_s8 + $0x48] sm:$0xff] }
0x15a3   :  { %v2936_v63 = vpack.c.bf16 %v2270_v59, %v2269_v58 }
0x15a4   :  { %2002 = vrot.lane.b32.xlu0 %v1995_v21, %s3118_s2  ;;  %v2295_v21 = vld [vmem:[%s3765_s8 + $0xd0] sm:$0xff] }
0x15a5   :  { %v1969_v23 = vpop.permute.xlu1 %1968  ;;  %2937 = vmatpush3.bf16.msra.mxu1 %v2936_v63 }
0x15a6   :  { %v1971_v31 = vmul.f32 %v3094_v61, %v1969_v23  ;;  %v2287_v61 = vld [vmem:[%s3765_s8 + $0x90] sm:$0xff]  ;;  %v2296_v23 = vld [vmem:[%s3765_s8 + $0xd8] sm:$0xff] }
0x15a7   :  { %v2938_v0 = vpack.c.bf16 %v2288_v27, %v2287_v61  ;;  %v2028_v61 = vld [vmem:[#allocation2 + $0xa0] sm:$0xff] }
0x15a8   :  { %1586 = vrot.lane.b32.xlu0 %v3512_v55, %s3118_s2 }
0x15a9   :  { %v1795_v57 = vpop.permute.xlu1 %1794  ;;  %2939 = vmatprep.subr.bf16.mxu1 %v2938_v0 }
0x15aa   :  { %1797 = vst.msk [vmem:[#allocation3 + $0x8] sm:$0xff] %vm548_vm3, %v1795_v57  ;;  %2941 = vmatpush3.bf16.msra.mxu1 %v2940_v30  ;;  %v2952_v57 = vpack.c.bf16 %v2278_v22, %v2277_v6 }
0x15ab   :  { %2943 = vmatprep.subr.bf16.mxu1 %v2942_v15 }
0x15ac   :  { %1170 = vrot.lane.b32.xlu0 %v3454_v29, %s3118_s2 }
0x15ad   :  { %v1379_v25 = vpop.permute.xlu1 %1378 }
0x15ae   :  { %1381 = vst.msk [vmem:[#allocation3 + $0x18] sm:$0xff] %vm548_vm3, %v1379_v25  ;;  %2945 = vmatpush3.bf16.msra.mxu1 %v2944_v8  ;;  %v2954_v25 = vpack.c.bf16 %v2296_v23, %v2295_v21 }
0x15af   :  { %2947 = vmatprep.subr.bf16.mxu1 %v2946_v11  ;;  %v2299_v11 = vld [vmem:[%s3765_s8 + $0xf0] sm:$0xff] }
0x15b0   :  { %754 = vrot.lane.b32.xlu0 %v3398_v56, %s3118_s2  ;;  %v2962_v12 = vpack.c.bf16 %v2300_v24, %v2299_v11 }
0x15b1   :  { %v963_v26 = vpop.permute.xlu1 %962  ;;  %v2007_v28 = vld [vmem:[#allocation3 + $0x8] sm:$0xff] }
0x15b2   :  { %965 = vst.msk [vmem:[#allocation3 + $0x28] sm:$0xff] %vm548_vm3, %v963_v26  ;;  %2949 = vmatpush3.bf16.msra.mxu1 %v2948_v9  ;;  %v2279_v26 = vld [vmem:[%s3765_s8 + $0x50] sm:$0xff]  ;;  %v2964_v9 = vpack.c.bf16 %v2284_v18, %v2283_v13 }
0x15b3   :  { %1584 = vst.msk [vmem:[#allocation3 + $0x28] sm:$0xff] %vm313_vm2, %v3522_v62  ;;  %2951 = vmatprep.subr.bf16.mxu1 %v2950_v46  ;;  %v2183_v46 = vld [vmem:[%s3766_s7] sm:$0x3] }
0x15b4   :  { %1997 = vrot.lane.b32.xlu0 %v1971_v31, %s3119_s20  ;;  %v2280_v31 = vld [vmem:[%s3765_s8 + $0x58] sm:$0xff]  ;;  %v2188_v6 = vrot.slane %v2183_v46, %v55_v33  ;;  %v2192_v22 = vrot.slane %v2183_v46, %v59_v35 }
0x15b5   :  { %v546_v55 = vpop.permute.xlu1 %545  ;;  %v2009_v60 = vld [vmem:[#allocation3 + $0x18] sm:$0xff] }
0x15b6   :  { %549 = vst.msk [vmem:[#allocation3 + $0x38] sm:$0xff] %vm548_vm3, %v546_v55  ;;  %v2297_v55 = vld [vmem:[%s3765_s8 + $0xe0] sm:$0xff]  ;;  %2953 = vmatpush3.bf16.msra.mxu1 %v2952_v57 }
0x15b7   :  { %2955 = vmatprep.subr.bf16.mxu1 %v2954_v25 }
0x1616   :  { %v2003_v36 = vpop.permute.xlu0 %2002 }
0x1617   :  { %2005 = vst.msk [vmem:[#allocation3] sm:$0xff] %vm548_vm3, %v2003_v36  ;;  %v2298_v36 = vld [vmem:[%s3765_s8 + $0xe8] sm:$0xff] }
0x161a   :  { %v1587_v29 = vpop.permute.xlu0 %1586 }
0x161b   :  { %1589 = vst.msk [vmem:[#allocation3 + $0x10] sm:$0xff] %vm548_vm3, %v1587_v29  ;;  %v2956_v29 = vpack.c.bf16 %v2280_v31, %v2279_v26 }
0x161d   :  { %2957 = vmatpush3.bf16.msra.mxu1 %v2956_v29 }
0x161e   :  { %v1171_v56 = vpop.permute.xlu0 %1170  ;;  %v2006_v39 = vld [vmem:[#allocation3] sm:$0xff] }
0x161f   :  { %1173 = vst.msk [vmem:[#allocation3 + $0x20] sm:$0xff] %vm548_vm3, %v1171_v56  ;;  %2794 = vmatprep.mubr.msk.f32.mxu0 %vm2030_vm4, %v2006_v39  ;;  %v2958_v56 = vpack.c.bf16 %v2298_v36, %v2297_v55  ;;  %v2281_v39 = vld [vmem:[%s3765_s8 + $0x60] sm:$0xff] }
0x1620   :  { %1376 = vst.msk [vmem:[#allocation3 + $0x20] sm:$0xff] %vm313_vm2, %v3492_v17  ;;  %2795 = vmatmul.mubr.msk.f32.vlgmr.msra.gmra.mrb[30].mxu0 %vm2030_vm4, %v2007_v28  ;;  %v2011_v17 = vld [vmem:[#allocation3 + $0x28] sm:$0xff] }
0x1621   :  { %v2282_v28 = vld [vmem:[%s3765_s8 + $0x68] sm:$0xff]  ;;  %2959 = vmatprep.subr.bf16.mxu1 %v2958_v56 }
0x1622   :  { %v755_v62 = vpop.permute.xlu0 %754  ;;  %v2008_v40 = vld [vmem:[#allocation3 + $0x10] sm:$0xff] }
0x1623   :  { %757 = vst.msk [vmem:[#allocation3 + $0x30] sm:$0xff] %vm548_vm3, %v755_v62  ;;  %2797 = vmatprep.mubr.msk.f32.mxu0 %vm2030_vm4, %v2008_v40  ;;  %v2960_v62 = vpack.c.bf16 %v2282_v28, %v2281_v39  ;;  %v2023_v40 = vld [vmem:[#allocation2 + $0x28] sm:$0xff] }
0x1624   :  { %1792 = vst.msk [vmem:[#allocation3 + $0x30] sm:$0xff] %vm313_vm2, %v3543_v19  ;;  %2798 = vmatmul.mubr.msk.f32.gmra.mrb[32].mxu0 %vm2030_vm4, %v2009_v60  ;;  %v2176_v19 = vld [vmem:[%s3764_s6 + $0x8] sm:$0xff] }
0x1625   :  { %v2926_v37 = vpack.c.bf16 %v2178_v45, %v2176_v19  ;;  %2961 = vmatpush3.bf16.msra.mxu1 %v2960_v62  ;;  %v2025_v19 = vld [vmem:[#allocation2 + $0x58] sm:$0xff] }
0x1626   :  { %v1998_v41 = vpop.permute.xlu0 %1997  ;;  %2963 = vmatprep.subr.bf16.mxu1 %v2962_v12 }
0x1627   :  { %2000 = vst.msk [vmem:[#allocation3 + $0x38] sm:$0xff] %vm313_vm2, %v1998_v41  ;;  %v2010_v49 = vld [vmem:[#allocation3 + $0x20] sm:$0xff]  ;;  %2927 = vmatprep.subr.bf16.mxu0 %v2926_v37 }
0x1628   :  { %2800 = vmatprep.mubr.msk.f32.mxu0 %vm2030_vm4, %v2010_v49  ;;  %2929 = vmatpush1.bf16.msra.mxu0 %v2928_v38  ;;  %v2024_v37 = vld [vmem:[#allocation2 + $0x40] sm:$0xff] }
0x1629   :  { %2801 = vmatmul.mubr.msk.f32.gmra.mrb[34].mxu0 %vm2030_vm4, %v2011_v17  ;;  %v2022_v17 = vld [vmem:[#allocation2 + $0x10] sm:$0xff]  ;;  %2965 = vmatpush3.bf16.msra.mxu1 %v2964_v9 }
0x162b   :  { %v2012_v42 = vld [vmem:[#allocation3 + $0x30] sm:$0xff] }
0x162c   :  { %2803 = vmatprep.mubr.msk.f32.mxu0 %vm2030_vm4, %v2012_v42 }
0x162e   :  { %v2013_v43 = vld [vmem:[#allocation3 + $0x38] sm:$0xff] }
0x162f   :  { %2804 = vmatmul.mubr.msk.f32.gmra.mrb[36].mxu0 %vm2030_vm4, %v2013_v43 }
0x1630   :  { %2262 = vmatprep.mubr.f32.mxu0 %v3115_v3  ;;  %v2180_v3 = vld [vmem:[%s3764_s6 + $0x28] sm:$0xff] }
0x1631   :  { %v2930_v51 = vpack.c.bf16 %v2182_v50, %v2180_v3  ;;  %v2027_v3 = vld [vmem:[#allocation2 + $0x88] sm:$0xff] }
0x1633   :  { %2931 = vmatprep.subr.bf16.mxu0 %v2930_v51  ;;  %v2026_v51 = vld [vmem:[#allocation2 + $0x70] sm:$0xff] }
0x1634   :  { %2933 = vmatpush1.bf16.msra.mxu0 %v2932_v54 }
0x16f3   :  { %v2796_v60 = vpop.f32.mrb[30].mxu0 }
0x16f4   :  { %v2127_v41 = vadd.f32 %v2796_v60, %v2023_v40  ;;  %v2121_v49 = vpop.f32.mrb[31].mxu0 }
0x16f5   :  { %v2122_v42 = vadd.f32 %v2121_v49, %v2022_v17 }
0x16f6   :  { %3099 = vtanh.f32 %v2127_v41 }
0x16f7   :  { %3101 = vtanh.f32 %v2122_v42  ;;  %v2799_v43 = vpop.f32.mrb[32].mxu0 }
0x16f8   :  { %v2131_v45 = vpop.f32.mrb[33].mxu0  ;;  %v2137_v47 = vadd.f32 %v2799_v43, %v2025_v19 }
0x16f9   :  { %v2132_v48 = vadd.f32 %v2131_v45, %v2024_v37 }
0x16fb   :  { %3103 = vtanh.f32 %v2132_v48 }
0x16fc   :  { %v2802_v38 = vpop.f32.mrb[34].mxu0  ;;  %3105 = vtanh.f32 %v2137_v47 }
0x16fd   :  { %v2141_v50 = vpop.f32.mrb[35].mxu0  ;;  %v2147_v5 = vadd.f32 %v2802_v38, %v2027_v3 }
0x16fe   :  { %v2142_v53 = vadd.f32 %v2141_v50, %v2026_v51 }
0x1700   :  { %v3100_v54 = vpop.eup %3099  ;;  %3107 = vtanh.f32 %v2142_v53 }
0x1701   :  { %v3102_v44 = vpop.eup %3101  ;;  %3109 = vtanh.f32 %v2147_v5 }
0x1702   :  { %v2168_v10 = vmax.f32 %v3102_v44, %v3100_v54  ;;  %v2805_v58 = vpop.f32.mrb[36].mxu0 }
0x1703   :  { %v2151_v59 = vpop.f32.mrb[37].mxu0  ;;  %v2157_v27 = vadd.f32 %v2805_v58, %v2029_v34 }
0x1704   :  { %v2152_v63 = vadd.f32 %v2151_v59, %v2028_v61 }
0x1705   :  { %v3104_v0 = vpop.eup %3103 }
0x1706   :  { %v2169_v2 = vmax.f32 %v2168_v10, %v3104_v0  ;;  %3111 = vtanh.f32 %v2152_v63  ;;  %v3106_v16 = vpop.eup %3105 }
0x1707   :  { %3113 = vtanh.f32 %v2157_v27 }
0x1708   :  { %v2170_v4 = vmax.f32 %v2169_v2, %v3106_v16 }
0x170a   :  { %v3108_v14 = vpop.eup %3107 }
0x170b   :  { %v2171_v30 = vmax.f32 %v2170_v4, %v3108_v14  ;;  %v3110_v15 = vpop.eup %3109 }
0x170d   :  { %v2172_v7 = vmax.f32 %v2171_v30, %v3110_v15 }
0x1710   :  { %v3112_v20 = vpop.eup %3111 }
0x1711   :  { %v2173_v1 = vmax.f32 %v2172_v7, %v3112_v20  ;;  %v3114_v52 = vpop.eup %3113 }
0x1713   :  { %v2174_v8 = vmax.f32 %v2173_v1, %v3114_v52 }
0x1715   :  { %2443 = vmatmul.mubr.msk.f32.vlgmr.msra.gmra.mrb[38].mxu0 %vm313_vm2, %v2174_v8 }
0x17e8   :  { %v2264_v21 = vpop.f32.mrb[38].mxu0 }
0x17e9   :  { %v2265_v23 = vadd.f32 %v2264_v21, %v2188_v6  ;;  %v2266_v57 = vpop.f32.mrb[39].mxu0 }
0x17ea   :  { %v2267_v25 = vadd.f32 %v2266_v57, %v2192_v22 }
0x17eb   :  { %2378 = vst [vmem:[%s3767_s10] sm:$0xff] %v2265_v23 }
0x17ec   :  { %2379 = vst [vmem:[%s3767_s10 + $0x8] sm:$0xff] %v2267_v25  ;;  %2372 = vmatprep.mubr.f32.mxu1 %v2267_v25 }
0x17ed   :  { %2373 = vmatmul.mubr.f32.vlgmr.msra.gmra.mrb[26].mxu1 %v2265_v23 }
0x18c0   :  { %v2583_v26 = vpop.f32.mrb[26].mxu1 }
0x18c1   :  { %v2584_v33 = vpop.f32.mrb[27].mxu1 }
0x18c2   :  { %v2585_v35 = vadd.f32 %v2584_v33, %v2583_v26 }
0x18c4   :  { %v2375_v31 = vadd.f32 %v2585_v35, %v2444_v32 }
0x18c6   :  { %2380 = vst [vmem:[%s3769_s11] sm:$0xff] %v2375_v31 }

</bundles_post_ra>
